<compile_context>
chip_gen: v7x
topology: tpu7x:2x2x1
jax: 0.10.0
libtpu: 0.0.40
codegen_flags: <defaults>
</compile_context>

<pallas_src>
import functools

import jax
import jax.numpy as jnp
from jax.experimental import pallas as pl
from jax.experimental.pallas import tpu as pltpu


def _round_up(x, m):
    return ((x + m - 1) // m) * m


# --------------------------------------------------------------------------- #
# Pallas kernel (one grid step == one (batch, point-tile) pair)               #
# --------------------------------------------------------------------------- #
def _swfp_kernel(pc_ref, ccT_ref, cf_ref, pf_ref, pfM_ref,
                 w1a_ref, w1b_ref, b1_ref, w2_ref, b2_ref,
                 wma_ref, wmb_ref, bm_ref,
                 y_ref, idx_ref, wgt_ref, *, k, m_valid):
    f32 = jnp.float32
    pc = pc_ref[0]      # [3,   TN]   point coords (this tile)
    ccT = ccT_ref[0]    # [Mp,  3 ]   center coords (transposed, padded)
    cf = cf_ref[0]      # [Cin, Mp]   center features
    pf = pf_ref[0]      # [Csa, TN]   point features (this tile)
    pfM = pfM_ref[0]    # [Csa, Mp]   first M point features (grouping table)
    mp = ccT.shape[0]
    tn = pc.shape[1]

    # ---- pairwise squared distances on the MXU: d[m,n] = |c_m|^2+|p_n|^2-2 c.p ----
    cnorm = jnp.sum(ccT * ccT, axis=1, keepdims=True)                # [Mp, 1]
    pnorm = jnp.sum(pc * pc, axis=0, keepdims=True)                  # [1,  TN]
    cross = jnp.dot(ccT, pc, preferred_element_type=f32)             # [Mp, TN] (MXU)
    d = cnorm + pnorm - 2.0 * cross                                  # [Mp, TN]

    c_iota = jax.lax.broadcasted_iota(jnp.int32, (mp, tn), 0)        # center index rows
    if m_valid < mp:                                                 # padded centers
        d = jnp.where(c_iota >= m_valid, jnp.inf, d)                 # never selectable

    # ---- phase 1: k rounds of masked argmin over centers (sublane reductions) ----
    idx_rows, onehots = [], []
    for _ in range(k):
        dmin = jnp.min(d, axis=0, keepdims=True)                                 # [1, TN]
        idx_j = jnp.min(jnp.where(d <= dmin, c_iota, mp), axis=0, keepdims=True)  # [1, TN]
        sel = c_iota == idx_j                                                    # [Mp, TN]
        d = jnp.where(sel, jnp.inf, d)                                           # mask selected
        idx_rows.append(idx_j)
        onehots.append(sel.astype(f32))

    # ---- phase 2: similarity MLP batched over all k neighbours ----
    # h_j = relu(W1a @ f0_j + W1b @ pf + b1),  f0_j = pfM @ onehot_j
    #     = relu(G @ onehot_j + f1h + b1)      with G = W1a @ pfM   (hoisted)
    g_tab = jnp.dot(w1a_ref[...], pfM, preferred_element_type=f32)   # [Csa, Mp]
    f1h = jnp.dot(w1b_ref[...], pf, preferred_element_type=f32)      # [Csa, TN]
    onehot_all = jnp.concatenate(onehots, axis=1)                    # [Mp, k*TN]
    h = jnp.maximum(
        jnp.dot(g_tab, onehot_all, preferred_element_type=f32)
        + jnp.concatenate([f1h] * k, axis=1) + b1_ref[...], 0.0)     # [Csa, k*TN]
    # 1-wide second conv as VPU multiply + sublane reduce (no 1-column MXU matmul)
    logit = jnp.sum(h * w2_ref[...], axis=0, keepdims=True) + b2_ref[...]   # [1, k*TN]
    w_all = 1.0 / (1.0 + jnp.exp(-logit))                            # sigmoid

    # ---- weighted kNN interpolation + SharedMLP (Conv1x1 + BN + ReLU) ----
    wmat = jnp.zeros((mp, tn), f32)                                  # weights over centers
    w_rows = []
    for j in range(k):
        w_j = w_all[:, j * tn:(j + 1) * tn]                          # [1, TN]
        wmat = wmat + jnp.where(c_iota == idx_rows[j], w_j, 0.0)
        w_rows.append(w_j)

    interp = jnp.dot(cf, wmat, preferred_element_type=f32)           # [Cin, TN]
    y = jnp.maximum(
        jnp.dot(wma_ref[...], interp, preferred_element_type=f32)
        + jnp.dot(wmb_ref[...], pf, preferred_element_type=f32)
        + bm_ref[...], 0.0)                                          # [Cout, TN]

    # lane-dense stores, already in PyTorch layout
    y_ref[0] = y                                                     # [Cout, TN]
    idx_ref[0] = jnp.concatenate(idx_rows, axis=0)                   # [k, TN]
    wgt_ref[0] = jnp.concatenate(w_rows, axis=0)                     # [k, TN]


# --------------------------------------------------------------------------- #
# Wrapper (tiling / padding glue + pallas_call)                               #
# --------------------------------------------------------------------------- #
def pointnet_swfp_forward(points_coords, centers_coords, centers_features,
                          points_features, params, k):
    B, _, N = points_coords.shape
    M = centers_coords.shape[-1]
    Cin = centers_features.shape[1]
    Csa = points_features.shape[1]
    Cout = params["wma"].shape[0]
    assert M <= N, "grouping(points_features, indices) requires M <= N"

    # -- tile over points.  TN=256 keeps per-tile [Mp,TN] temporaries small enough
    #    for v7x's 64 MiB VMEM while amortizing per-grid-step overhead.
    tn_target = 256
    if N <= tn_target:
        tn, n_tiles = N, 1
    else:
        tn = tn_target
        n_tiles = pl.cdiv(N, tn)
    n_pad = n_tiles * tn

    # -- pad centers to a multiple of 128 lanes (aligned MXU contraction / loads).
    m_pad = _round_up(M, 128)

    pc = points_coords                     # [B, 3, N]   (native, no transpose)
    pf = points_features                   # [B, Csa, N] (native, no transpose)
    if n_pad != N:
        pc = jnp.pad(pc, ((0, 0), (0, 0), (0, n_pad - N)))
        pf = jnp.pad(pf, ((0, 0), (0, 0), (0, n_pad - N)))

    ccT = jnp.transpose(centers_coords, (0, 2, 1))     # [B, M, 3]  (tiny tensor)
    cf = centers_features                              # [B, Cin, M]
    pfM = points_features[:, :, :M]                    # literal torch grouping table
    if m_pad != M:
        ccT = jnp.pad(ccT, ((0, 0), (0, m_pad - M), (0, 0)))
        cf = jnp.pad(cf, ((0, 0), (0, 0), (0, m_pad - M)))
        pfM = jnp.pad(pfM, ((0, 0), (0, 0), (0, m_pad - M)))

    def tile3(c):          # per-(batch, N-tile) block
        return pl.BlockSpec((1, c, tn), lambda b, n: (b, 0, n))

    def whole3(s1, s2):    # per-batch block, constant over N tiles
        return pl.BlockSpec((1, s1, s2), lambda b, n: (b, 0, 0))

    def param2(shape):     # small replicated parameter
        return pl.BlockSpec(tuple(shape), lambda b, n: (0, 0))

    kern = functools.partial(_swfp_kernel, k=k, m_valid=M)

    y, idx, wgt = pl.pallas_call(
        kern,
        out_shape=(jax.ShapeDtypeStruct((B, Cout, n_pad), jnp.float32),
                   jax.ShapeDtypeStruct((B, k, n_pad), jnp.int32),
                   jax.ShapeDtypeStruct((B, k, n_pad), jnp.float32)),
        grid=(B, n_tiles),
        in_specs=[tile3(3), whole3(m_pad, 3), whole3(Cin, m_pad), tile3(Csa),
                  whole3(Csa, m_pad),
                  param2(params["w1a"].shape), param2(params["w1b"].shape),
                  param2(params["b1"].shape), param2(params["w2"].shape),
                  param2(params["b2"].shape), param2(params["wma"].shape),
                  param2(params["wmb"].shape), param2(params["bm"].shape)],
        out_specs=(pl.BlockSpec((1, Cout, tn), lambda b, n: (b, 0, n)),
                   pl.BlockSpec((1, k, tn), lambda b, n: (b, 0, n)),
                   pl.BlockSpec((1, k, tn), lambda b, n: (b, 0, n))),
        compiler_params=pltpu.CompilerParams(
            dimension_semantics=("parallel", "parallel")),
    )(pc, ccT, cf, pf, pfM,
      params["w1a"], params["w1b"], params["b1"], params["w2"], params["b2"],
      params["wma"], params["wmb"], params["bm"])

    if n_pad != N:
        y = y[:, :, :N]
        idx = idx[:, :, :N]
        wgt = wgt[:, :, :N]
    # matches torch: (mlp(interp_cat), points_coords, indices, weights)
    return y, points_coords, idx, wgt


# --------------------------------------------------------------------------- #
# Deterministic parameter construction (BN folded into the 1x1 convs)          #
# --------------------------------------------------------------------------- #
def make_params(key, in_channels, sa_in_channels, out_channels, eps=1e-5):
    csa, cin, cout = sa_in_channels, in_channels, out_channels
    ks = jax.random.split(key, 14)
    conv1_w = 0.3 * jax.random.normal(ks[0], (csa, 2 * csa), jnp.float32)   # Conv2d(2*Csa->Csa,1)
    conv1_b = 0.1 * jax.random.normal(ks[1], (csa,), jnp.float32)
    bn1_g = 1.0 + 0.1 * jax.random.normal(ks[2], (csa,), jnp.float32)       # BatchNorm2d(Csa)
    bn1_b = 0.1 * jax.random.normal(ks[3], (csa,), jnp.float32)
    bn1_m = 0.1 * jax.random.normal(ks[4], (csa,), jnp.float32)
    bn1_v = jax.random.uniform(ks[5], (csa,), jnp.float32, 0.5, 1.5)
    conv2_w = 0.3 * jax.random.normal(ks[6], (1, csa), jnp.float32)         # Conv2d(Csa->1,1)
    conv2_b = 0.1 * jax.random.normal(ks[7], (1,), jnp.float32)
    mlp_w = 0.3 * jax.random.normal(ks[8], (cout, cin + csa), jnp.float32)  # Conv1d(Cin+Csa->Cout,1)
    mlp_b = 0.1 * jax.random.normal(ks[9], (cout,), jnp.float32)
    bnm_g = 1.0 + 0.1 * jax.random.normal(ks[10], (cout,), jnp.float32)     # BatchNorm1d(Cout)
    bnm_b = 0.1 * jax.random.normal(ks[11], (cout,), jnp.float32)
    bnm_m = 0.1 * jax.random.normal(ks[12], (cout,), jnp.float32)
    bnm_v = jax.random.uniform(ks[13], (cout,), jnp.float32, 0.5, 1.5)

    s1 = bn1_g / jnp.sqrt(bn1_v + eps)
    w1_eff = conv1_w * s1[:, None]
    b1_eff = (conv1_b - bn1_m) * s1 + bn1_b
    sm = bnm_g / jnp.sqrt(bnm_v + eps)
    wm_eff = mlp_w * sm[:, None]
    bm_eff = (mlp_b - bnm_m) * sm + bnm_b

    return {
        "w1a": w1_eff[:, :csa],             # [Csa, Csa]  acts on grouped features f0
        "w1b": w1_eff[:, csa:],             # [Csa, Csa]  acts on repeated features f1
        "b1": b1_eff.reshape(csa, 1),
        "w2": jnp.transpose(conv2_w),       # [Csa, 1]
        "b2": conv2_b.reshape(1, 1),
        "wma": wm_eff[:, :cin],             # [Cout, Cin]
        "wmb": wm_eff[:, cin:],             # [Cout, Csa]
        "bm": bm_eff.reshape(cout, 1),
    }


# --------------------------------------------------------------------------- #
# Pure-JAX reference of the same (folded) module for cross-checking            #
# --------------------------------------------------------------------------- #
def _reference(points_coords, centers_coords, centers_features, points_features, p, k):
    B, _, N = points_coords.shape
    M = centers_coords.shape[-1]
    Cin = centers_features.shape[1]
    Csa = points_features.shape[1]

    pn = jnp.sum(points_coords ** 2, axis=1)                                # [B, N]
    cn = jnp.sum(centers_coords ** 2, axis=1)                               # [B, M]
    cross = jnp.einsum("bdn,bdm->bnm", points_coords, centers_coords)
    d = pn[:, :, None] + cn[:, None, :] - 2.0 * cross                       # [B, N, M]
    idx = jnp.transpose(jnp.argsort(d, axis=-1)[:, :, :k], (0, 2, 1))       # [B, k, N]

    pf_b = jnp.broadcast_to(points_features[:, :, None, :], (B, Csa, k, N))
    gi = jnp.broadcast_to(idx[:, None, :, :], (B, Csa, k, N))
    f0 = jnp.take_along_axis(pf_b, gi, axis=3)                              # grouping()
    f1 = pf_b
    h = jax.nn.relu(jnp.einsum("oc,bckn->bokn", p["w1a"], f0)
                    + jnp.einsum("oc,bckn->bokn", p["w1b"], f1)
                    + p["b1"].reshape(1, Csa, 1, 1))
    logit = jnp.einsum("c,bckn->bkn", p["w2"][:, 0], h) + p["b2"].reshape(1, 1, 1)
    wgt = jax.nn.sigmoid(logit)                                             # [B, k, N]

    cf_b = jnp.broadcast_to(centers_features[:, :, None, :], (B, Cin, k, M))
    gi2 = jnp.broadcast_to(idx[:, None, :, :], (B, Cin, k, N))
    cf_g = jnp.take_along_axis(cf_b, gi2, axis=3)
    interp = jnp.sum(cf_g * wgt[:, None, :, :], axis=2)                     # [B, Cin, N]

    y = jax.nn.relu(jnp.einsum("oc,bcn->bon", p["wma"], interp)
                    + jnp.einsum("oc,bcn->bon", p["wmb"], points_features)
                    + p["bm"].reshape(1, -1, 1))
    return y, idx, wgt


# --------------------------------------------------------------------------- #
if __name__ == "__main__":
    B, N, M, K = 2, 16, 8, 3
    IN_CH, SA_IN_CH, OUT_CH = 8, 4, 32     # in_channels, sa_in_channels, out_channels

    root = jax.random.PRNGKey(0)
    kin, kparams = jax.random.split(root)
    k1, k2, k3, k4 = jax.random.split(kin, 4)
    points_coords = jax.random.normal(k1, (B, 3, N), jnp.float32)
    centers_coords = jax.random.normal(k2, (B, 3, M), jnp.float32)
    centers_features = jax.random.normal(k3, (B, IN_CH, M), jnp.float32)
    points_features = jax.random.normal(k4, (B, SA_IN_CH, N), jnp.float32)

    params = make_params(kparams, IN_CH, SA_IN_CH, OUT_CH)

    out, pc_out, indices, weights = pointnet_swfp_forward(
        points_coords, centers_coords, centers_features, points_features, params, K)
    jax.block_until_ready((out, indices, weights))

    # cross-check against the pure-JAX reference
    y_ref, idx_ref, w_ref = _reference(points_coords, centers_coords,
                                       centers_features, points_features, params, K)
    assert out.shape == (B, OUT_CH, N)
    assert indices.shape == (B, K, N) and weights.shape == (B, K, N)
    assert jnp.array_equal(indices, idx_ref)
    assert jnp.allclose(weights, w_ref, rtol=1e-3, atol=1e-3)
    assert jnp.allclose(out, y_ref, rtol=1e-3, atol=1e-3)

    print("KERNEL_OK")
</pallas_src>

<mosaic_0001>
module attributes {stable_mosaic.version = 11 : i64} {
  func.func @_swfp_kernel(%arg0: i32, %arg1: i32, %arg2: memref<1x3x16xf32, #tpu.memory_space<vmem>>, %arg3: memref<1x128x3xf32, #tpu.memory_space<vmem>>, %arg4: memref<1x8x128xf32, #tpu.memory_space<vmem>>, %arg5: memref<1x4x16xf32, #tpu.memory_space<vmem>>, %arg6: memref<1x4x128xf32, #tpu.memory_space<vmem>>, %arg7: memref<4x4xf32, #tpu.memory_space<vmem>>, %arg8: memref<4x4xf32, #tpu.memory_space<vmem>>, %arg9: memref<4x1xf32, #tpu.memory_space<vmem>>, %arg10: memref<4x1xf32, #tpu.memory_space<vmem>>, %arg11: memref<1x1xf32, #tpu.memory_space<vmem>>, %arg12: memref<32x8xf32, #tpu.memory_space<vmem>>, %arg13: memref<32x4xf32, #tpu.memory_space<vmem>>, %arg14: memref<32x1xf32, #tpu.memory_space<vmem>>, %arg15: memref<1x32x16xf32, #tpu.memory_space<vmem>>, %arg16: memref<1x3x16xi32, #tpu.memory_space<vmem>>, %arg17: memref<1x3x16xf32, #tpu.memory_space<vmem>>) attributes {dimension_semantics = [#tpu.dimension_semantics<parallel>, #tpu.dimension_semantics<parallel>], iteration_bounds = array<i64: 2, 1>, scalar_prefetch = 0 : i64, scratch_operands = 0 : i64, tpu.core_type = #tpu.core_type<tc>, window_params = [{transform_indices = @transform_0, window_bounds = array<i64: 1, 3, 16>}, {transform_indices = @transform_1, window_bounds = array<i64: 1, 128, 3>}, {transform_indices = @transform_2, window_bounds = array<i64: 1, 8, 128>}, {transform_indices = @transform_3, window_bounds = array<i64: 1, 4, 16>}, {transform_indices = @transform_4, window_bounds = array<i64: 1, 4, 128>}, {pipeline_mode = #tpu.pipeline_mode<synchronous>, transform_indices = @transform_5, window_bounds = array<i64: 4, 4>}, {pipeline_mode = #tpu.pipeline_mode<synchronous>, transform_indices = @transform_6, window_bounds = array<i64: 4, 4>}, {pipeline_mode = #tpu.pipeline_mode<synchronous>, transform_indices = @transform_7, window_bounds = array<i64: 4, 1>}, {pipeline_mode = #tpu.pipeline_mode<synchronous>, transform_indices = @transform_8, window_bounds = array<i64: 4, 1>}, {pipeline_mode = #tpu.pipeline_mode<synchronous>, transform_indices = @transform_9, window_bounds = array<i64: 1, 1>}, {pipeline_mode = #tpu.pipeline_mode<synchronous>, transform_indices = @transform_10, window_bounds = array<i64: 32, 8>}, {pipeline_mode = #tpu.pipeline_mode<synchronous>, transform_indices = @transform_11, window_bounds = array<i64: 32, 4>}, {pipeline_mode = #tpu.pipeline_mode<synchronous>, transform_indices = @transform_12, window_bounds = array<i64: 32, 1>}, {transform_indices = @transform_13, window_bounds = array<i64: 1, 32, 16>}, {transform_indices = @transform_14, window_bounds = array<i64: 1, 3, 16>}, {transform_indices = @transform_15, window_bounds = array<i64: 1, 3, 16>}]} {
    %c0 = arith.constant 0 : index
    %c0_0 = arith.constant 0 : index
    %c0_1 = arith.constant 0 : index
    %0 = vector.load %arg2[%c0, %c0_0, %c0_1] : memref<1x3x16xf32, #tpu.memory_space<vmem>>, vector<1x3x16xf32>
    %1 = vector.shape_cast %0 : vector<1x3x16xf32> to vector<3x16xf32>
    %c0_2 = arith.constant 0 : index
    %c0_3 = arith.constant 0 : index
    %c0_4 = arith.constant 0 : index
    %2 = vector.load %arg3[%c0_2, %c0_3, %c0_4] : memref<1x128x3xf32, #tpu.memory_space<vmem>>, vector<1x128x3xf32>
    %3 = vector.shape_cast %2 : vector<1x128x3xf32> to vector<128x3xf32>
    %c0_5 = arith.constant 0 : index
    %c0_6 = arith.constant 0 : index
    %c0_7 = arith.constant 0 : index
    %4 = vector.load %arg4[%c0_5, %c0_6, %c0_7] : memref<1x8x128xf32, #tpu.memory_space<vmem>>, vector<1x8x128xf32>
    %5 = vector.shape_cast %4 : vector<1x8x128xf32> to vector<8x128xf32>
    %c0_8 = arith.constant 0 : index
    %c0_9 = arith.constant 0 : index
    %c0_10 = arith.constant 0 : index
    %6 = vector.load %arg5[%c0_8, %c0_9, %c0_10] : memref<1x4x16xf32, #tpu.memory_space<vmem>>, vector<1x4x16xf32>
    %7 = vector.shape_cast %6 : vector<1x4x16xf32> to vector<4x16xf32>
    %c0_11 = arith.constant 0 : index
    %c0_12 = arith.constant 0 : index
    %c0_13 = arith.constant 0 : index
    %8 = vector.load %arg6[%c0_11, %c0_12, %c0_13] : memref<1x4x128xf32, #tpu.memory_space<vmem>>, vector<1x4x128xf32>
    %9 = vector.shape_cast %8 : vector<1x4x128xf32> to vector<4x128xf32>
    %10 = arith.mulf %3, %3 : vector<128x3xf32>
    %cst = arith.constant dense<0.000000e+00> : vector<128xf32>
    %11 = vector.multi_reduction <add>, %10, %cst [1] : vector<128x3xf32> to vector<128xf32>
    %12 = vector.shape_cast %11 : vector<128xf32> to vector<128x1xf32>
    %13 = arith.mulf %1, %1 : vector<3x16xf32>
    %cst_14 = arith.constant dense<0.000000e+00> : vector<16xf32>
    %14 = vector.multi_reduction <add>, %13, %cst_14 [0] : vector<3x16xf32> to vector<16xf32>
    %15 = vector.shape_cast %14 : vector<16xf32> to vector<1x16xf32>
    %cst_15 = arith.constant dense<0.000000e+00> : vector<128x16xf32>
    %16 = tpu.matmul %3, %1, %cst_15 {dimension_numbers = #tpu.dot_dimension_numbers<[1], [0], [0], [1], [0, 0, 1, 1], [], []>} : vector<128x3xf32>, vector<3x16xf32>, vector<128x16xf32> -> vector<128x16xf32>
    %17 = vector.broadcast %12 : vector<128x1xf32> to vector<128x16xf32>
    %18 = vector.broadcast %15 : vector<1x16xf32> to vector<128x16xf32>
    %19 = arith.addf %17, %18 : vector<128x16xf32>
    %cst_16 = arith.constant 2.000000e+00 : f32
    %20 = vector.broadcast %cst_16 : f32 to vector<128x16xf32>
    %21 = arith.mulf %20, %16 : vector<128x16xf32>
    %22 = arith.subf %19, %21 : vector<128x16xf32>
    %23 = tpu.iota {dimensions = array<i32: 0>} : vector<128x16xi32>
    %c8_i32 = arith.constant 8 : i32
    %24 = vector.broadcast %c8_i32 : i32 to vector<128x16xi32>
    %25 = arith.cmpi sge, %23, %24 : vector<128x16xi32>
    %cst_17 = arith.constant 0x7F800000 : f32
    %26 = vector.broadcast %cst_17 : f32 to vector<128x16xf32>
    %27 = arith.select %25, %26, %22 : vector<128x16xi1>, vector<128x16xf32>
    %cst_18 = arith.constant dense<0x7F800000> : vector<16xf32>
    %28 = vector.multi_reduction <minimumf>, %27, %cst_18 [0] : vector<128x16xf32> to vector<16xf32>
    %29 = vector.shape_cast %28 : vector<16xf32> to vector<1x16xf32>
    %30 = vector.broadcast %29 : vector<1x16xf32> to vector<128x16xf32>
    %31 = arith.cmpf ole, %27, %30 : vector<128x16xf32>
    %c128_i32 = arith.constant 128 : i32
    %32 = vector.broadcast %c128_i32 : i32 to vector<128x16xi32>
    %33 = arith.select %31, %23, %32 : vector<128x16xi1>, vector<128x16xi32>
    %cst_19 = arith.constant dense<2147483647> : vector<16xi32>
    %34 = vector.multi_reduction <minsi>, %33, %cst_19 [0] : vector<128x16xi32> to vector<16xi32>
    %35 = vector.shape_cast %34 : vector<16xi32> to vector<1x16xi32>
    %36 = vector.broadcast %35 : vector<1x16xi32> to vector<128x16xi32>
    %37 = arith.cmpi eq, %23, %36 : vector<128x16xi32>
    %cst_20 = arith.constant 0x7F800000 : f32
    %38 = vector.broadcast %cst_20 : f32 to vector<128x16xf32>
    %39 = arith.select %37, %38, %27 : vector<128x16xi1>, vector<128x16xf32>
    %40 = arith.extui %37 : vector<128x16xi1> to vector<128x16xi32>
    %41 = arith.sitofp %40 : vector<128x16xi32> to vector<128x16xf32>
    %cst_21 = arith.constant dense<0x7F800000> : vector<16xf32>
    %42 = vector.multi_reduction <minimumf>, %39, %cst_21 [0] : vector<128x16xf32> to vector<16xf32>
    %43 = vector.shape_cast %42 : vector<16xf32> to vector<1x16xf32>
    %44 = vector.broadcast %43 : vector<1x16xf32> to vector<128x16xf32>
    %45 = arith.cmpf ole, %39, %44 : vector<128x16xf32>
    %c128_i32_22 = arith.constant 128 : i32
    %46 = vector.broadcast %c128_i32_22 : i32 to vector<128x16xi32>
    %47 = arith.select %45, %23, %46 : vector<128x16xi1>, vector<128x16xi32>
    %cst_23 = arith.constant dense<2147483647> : vector<16xi32>
    %48 = vector.multi_reduction <minsi>, %47, %cst_23 [0] : vector<128x16xi32> to vector<16xi32>
    %49 = vector.shape_cast %48 : vector<16xi32> to vector<1x16xi32>
    %50 = vector.broadcast %49 : vector<1x16xi32> to vector<128x16xi32>
    %51 = arith.cmpi eq, %23, %50 : vector<128x16xi32>
    %cst_24 = arith.constant 0x7F800000 : f32
    %52 = vector.broadcast %cst_24 : f32 to vector<128x16xf32>
    %53 = arith.select %51, %52, %39 : vector<128x16xi1>, vector<128x16xf32>
    %54 = arith.extui %51 : vector<128x16xi1> to vector<128x16xi32>
    %55 = arith.sitofp %54 : vector<128x16xi32> to vector<128x16xf32>
    %cst_25 = arith.constant dense<0x7F800000> : vector<16xf32>
    %56 = vector.multi_reduction <minimumf>, %53, %cst_25 [0] : vector<128x16xf32> to vector<16xf32>
    %57 = vector.shape_cast %56 : vector<16xf32> to vector<1x16xf32>
    %58 = vector.broadcast %57 : vector<1x16xf32> to vector<128x16xf32>
    %59 = arith.cmpf ole, %53, %58 : vector<128x16xf32>
    %c128_i32_26 = arith.constant 128 : i32
    %60 = vector.broadcast %c128_i32_26 : i32 to vector<128x16xi32>
    %61 = arith.select %59, %23, %60 : vector<128x16xi1>, vector<128x16xi32>
    %cst_27 = arith.constant dense<2147483647> : vector<16xi32>
    %62 = vector.multi_reduction <minsi>, %61, %cst_27 [0] : vector<128x16xi32> to vector<16xi32>
    %63 = vector.shape_cast %62 : vector<16xi32> to vector<1x16xi32>
    %64 = vector.broadcast %63 : vector<1x16xi32> to vector<128x16xi32>
    %65 = arith.cmpi eq, %23, %64 : vector<128x16xi32>
    %66 = arith.extui %65 : vector<128x16xi1> to vector<128x16xi32>
    %67 = arith.sitofp %66 : vector<128x16xi32> to vector<128x16xf32>
    %c0_28 = arith.constant 0 : index
    %c0_29 = arith.constant 0 : index
    %68 = vector.load %arg7[%c0_28, %c0_29] : memref<4x4xf32, #tpu.memory_space<vmem>>, vector<4x4xf32>
    %cst_30 = arith.constant dense<0.000000e+00> : vector<4x128xf32>
    %69 = tpu.matmul %68, %9, %cst_30 {dimension_numbers = #tpu.dot_dimension_numbers<[1], [0], [0], [1], [0, 0, 1, 1], [], []>} : vector<4x4xf32>, vector<4x128xf32>, vector<4x128xf32> -> vector<4x128xf32>
    %c0_31 = arith.constant 0 : index
    %c0_32 = arith.constant 0 : index
    %70 = vector.load %arg8[%c0_31, %c0_32] : memref<4x4xf32, #tpu.memory_space<vmem>>, vector<4x4xf32>
    %cst_33 = arith.constant dense<0.000000e+00> : vector<4x16xf32>
    %71 = tpu.matmul %70, %7, %cst_33 {dimension_numbers = #tpu.dot_dimension_numbers<[1], [0], [0], [1], [0, 0, 1, 1], [], []>} : vector<4x4xf32>, vector<4x16xf32>, vector<4x16xf32> -> vector<4x16xf32>
    %72 = tpu.concatenate %41, %55, %67 in 1 : vector<128x16xf32>, vector<128x16xf32>, vector<128x16xf32> -> vector<128x48xf32>
    %cst_34 = arith.constant dense<0.000000e+00> : vector<4x48xf32>
    %73 = tpu.matmul %69, %72, %cst_34 {dimension_numbers = #tpu.dot_dimension_numbers<[1], [0], [0], [1], [0, 0, 1, 1], [], []>} : vector<4x128xf32>, vector<128x48xf32>, vector<4x48xf32> -> vector<4x48xf32>
    %74 = tpu.concatenate %71, %71, %71 in 1 : vector<4x16xf32>, vector<4x16xf32>, vector<4x16xf32> -> vector<4x48xf32>
    %75 = arith.addf %73, %74 : vector<4x48xf32>
    %c0_35 = arith.constant 0 : index
    %c0_36 = arith.constant 0 : index
    %76 = vector.load %arg9[%c0_35, %c0_36] : memref<4x1xf32, #tpu.memory_space<vmem>>, vector<4x1xf32>
    %77 = vector.broadcast %76 : vector<4x1xf32> to vector<4x48xf32>
    %78 = arith.addf %75, %77 : vector<4x48xf32>
    %cst_37 = arith.constant 0.000000e+00 : f32
    %79 = vector.broadcast %cst_37 : f32 to vector<4x48xf32>
    %80 = arith.maximumf %78, %79 : vector<4x48xf32>
    %c0_38 = arith.constant 0 : index
    %c0_39 = arith.constant 0 : index
    %81 = vector.load %arg10[%c0_38, %c0_39] : memref<4x1xf32, #tpu.memory_space<vmem>>, vector<4x1xf32>
    %82 = vector.broadcast %81 : vector<4x1xf32> to vector<4x48xf32>
    %83 = arith.mulf %80, %82 : vector<4x48xf32>
    %cst_40 = arith.constant dense<0.000000e+00> : vector<48xf32>
    %84 = vector.multi_reduction <add>, %83, %cst_40 [0] : vector<4x48xf32> to vector<48xf32>
    %85 = vector.shape_cast %84 : vector<48xf32> to vector<1x48xf32>
    %c0_41 = arith.constant 0 : index
    %c0_42 = arith.constant 0 : index
    %86 = vector.load %arg11[%c0_41, %c0_42] : memref<1x1xf32, #tpu.memory_space<vmem>>, vector<1x1xf32>
    %87 = vector.broadcast %86 : vector<1x1xf32> to vector<1x48xf32>
    %88 = arith.addf %85, %87 : vector<1x48xf32>
    %cst_43 = arith.constant 0.000000e+00 : f32
    %89 = vector.broadcast %cst_43 : f32 to vector<1x48xf32>
    %90 = arith.subf %89, %88 : vector<1x48xf32>
    %91 = math.exp %90 : vector<1x48xf32>
    %cst_44 = arith.constant 1.000000e+00 : f32
    %92 = vector.broadcast %cst_44 : f32 to vector<1x48xf32>
    %93 = arith.addf %92, %91 : vector<1x48xf32>
    %cst_45 = arith.constant 1.000000e+00 : f32
    %94 = vector.broadcast %cst_45 : f32 to vector<1x48xf32>
    %95 = arith.divf %94, %93 : vector<1x48xf32>
    %cst_46 = arith.constant 0.000000e+00 : f32
    %96 = vector.broadcast %cst_46 : f32 to vector<128x16xf32>
    %97 = vector.extract_strided_slice %95 {offsets = [0, 0], sizes = [1, 16], strides = [1, 1]} : vector<1x48xf32> to vector<1x16xf32>
    %98 = vector.broadcast %35 : vector<1x16xi32> to vector<128x16xi32>
    %99 = arith.cmpi eq, %23, %98 : vector<128x16xi32>
    %cst_47 = arith.constant 0.000000e+00 : f32
    %100 = vector.shape_cast %97 : vector<1x16xf32> to vector<1x16xf32>
    %101 = vector.broadcast %100 : vector<1x16xf32> to vector<128x16xf32>
    %102 = vector.broadcast %cst_47 : f32 to vector<128x16xf32>
    %103 = arith.select %99, %101, %102 : vector<128x16xi1>, vector<128x16xf32>
    %104 = arith.addf %96, %103 : vector<128x16xf32>
    %105 = vector.extract_strided_slice %95 {offsets = [0, 16], sizes = [1, 16], strides = [1, 1]} : vector<1x48xf32> to vector<1x16xf32>
    %106 = vector.broadcast %49 : vector<1x16xi32> to vector<128x16xi32>
    %107 = arith.cmpi eq, %23, %106 : vector<128x16xi32>
    %cst_48 = arith.constant 0.000000e+00 : f32
    %108 = vector.shape_cast %105 : vector<1x16xf32> to vector<1x16xf32>
    %109 = vector.broadcast %108 : vector<1x16xf32> to vector<128x16xf32>
    %110 = vector.broadcast %cst_48 : f32 to vector<128x16xf32>
    %111 = arith.select %107, %109, %110 : vector<128x16xi1>, vector<128x16xf32>
    %112 = arith.addf %104, %111 : vector<128x16xf32>
    %113 = vector.extract_strided_slice %95 {offsets = [0, 32], sizes = [1, 16], strides = [1, 1]} : vector<1x48xf32> to vector<1x16xf32>
    %114 = vector.broadcast %63 : vector<1x16xi32> to vector<128x16xi32>
    %115 = arith.cmpi eq, %23, %114 : vector<128x16xi32>
    %cst_49 = arith.constant 0.000000e+00 : f32
    %116 = vector.shape_cast %113 : vector<1x16xf32> to vector<1x16xf32>
    %117 = vector.broadcast %116 : vector<1x16xf32> to vector<128x16xf32>
    %118 = vector.broadcast %cst_49 : f32 to vector<128x16xf32>
    %119 = arith.select %115, %117, %118 : vector<128x16xi1>, vector<128x16xf32>
    %120 = arith.addf %112, %119 : vector<128x16xf32>
    %cst_50 = arith.constant dense<0.000000e+00> : vector<8x16xf32>
    %121 = tpu.matmul %5, %120, %cst_50 {dimension_numbers = #tpu.dot_dimension_numbers<[1], [0], [0], [1], [0, 0, 1, 1], [], []>} : vector<8x128xf32>, vector<128x16xf32>, vector<8x16xf32> -> vector<8x16xf32>
    %c0_51 = arith.constant 0 : index
    %c0_52 = arith.constant 0 : index
    %122 = vector.load %arg12[%c0_51, %c0_52] : memref<32x8xf32, #tpu.memory_space<vmem>>, vector<32x8xf32>
    %cst_53 = arith.constant dense<0.000000e+00> : vector<32x16xf32>
    %123 = tpu.matmul %122, %121, %cst_53 {dimension_numbers = #tpu.dot_dimension_numbers<[1], [0], [0], [1], [0, 0, 1, 1], [], []>} : vector<32x8xf32>, vector<8x16xf32>, vector<32x16xf32> -> vector<32x16xf32>
    %c0_54 = arith.constant 0 : index
    %c0_55 = arith.constant 0 : index
    %124 = vector.load %arg13[%c0_54, %c0_55] : memref<32x4xf32, #tpu.memory_space<vmem>>, vector<32x4xf32>
    %cst_56 = arith.constant dense<0.000000e+00> : vector<32x16xf32>
    %125 = tpu.matmul %124, %7, %cst_56 {dimension_numbers = #tpu.dot_dimension_numbers<[1], [0], [0], [1], [0, 0, 1, 1], [], []>} : vector<32x4xf32>, vector<4x16xf32>, vector<32x16xf32> -> vector<32x16xf32>
    %126 = arith.addf %123, %125 : vector<32x16xf32>
    %c0_57 = arith.constant 0 : index
    %c0_58 = arith.constant 0 : index
    %127 = vector.load %arg14[%c0_57, %c0_58] : memref<32x1xf32, #tpu.memory_space<vmem>>, vector<32x1xf32>
    %128 = vector.broadcast %127 : vector<32x1xf32> to vector<32x16xf32>
    %129 = arith.addf %126, %128 : vector<32x16xf32>
    %cst_59 = arith.constant 0.000000e+00 : f32
    %130 = vector.broadcast %cst_59 : f32 to vector<32x16xf32>
    %131 = arith.maximumf %129, %130 : vector<32x16xf32>
    %c0_60 = arith.constant 0 : index
    %c0_61 = arith.constant 0 : index
    %c0_62 = arith.constant 0 : index
    %132 = vector.load %arg15[%c0_60, %c0_61, %c0_62] : memref<1x32x16xf32, #tpu.memory_space<vmem>>, vector<1x32x16xf32>
    %133 = vector.shape_cast %132 : vector<1x32x16xf32> to vector<32x16xf32>
    %134 = vector.shape_cast %131 : vector<32x16xf32> to vector<1x32x16xf32>
    tpu.vector_store %arg15[%c0_60, %c0_61, %c0_62], %134 {strides = array<i32>} : memref<1x32x16xf32, #tpu.memory_space<vmem>>, vector<1x32x16xf32>,
    %135 = tpu.concatenate %35, %49, %63 in 0 : vector<1x16xi32>, vector<1x16xi32>, vector<1x16xi32> -> vector<3x16xi32>
    %c0_63 = arith.constant 0 : index
    %c0_64 = arith.constant 0 : index
    %c0_65 = arith.constant 0 : index
    %136 = vector.load %arg16[%c0_63, %c0_64, %c0_65] : memref<1x3x16xi32, #tpu.memory_space<vmem>>, vector<1x3x16xi32>
    %137 = vector.shape_cast %136 : vector<1x3x16xi32> to vector<3x16xi32>
    %138 = vector.shape_cast %135 : vector<3x16xi32> to vector<1x3x16xi32>
    tpu.vector_store %arg16[%c0_63, %c0_64, %c0_65], %138 {strides = array<i32>} : memref<1x3x16xi32, #tpu.memory_space<vmem>>, vector<1x3x16xi32>,
    %139 = tpu.concatenate %97, %105, %113 in 0 : vector<1x16xf32>, vector<1x16xf32>, vector<1x16xf32> -> vector<3x16xf32>
    %c0_66 = arith.constant 0 : index
    %c0_67 = arith.constant 0 : index
    %c0_68 = arith.constant 0 : index
    %140 = vector.load %arg17[%c0_66, %c0_67, %c0_68] : memref<1x3x16xf32, #tpu.memory_space<vmem>>, vector<1x3x16xf32>
    %141 = vector.shape_cast %140 : vector<1x3x16xf32> to vector<3x16xf32>
    %142 = vector.shape_cast %139 : vector<3x16xf32> to vector<1x3x16xf32>
    tpu.vector_store %arg17[%c0_66, %c0_67, %c0_68], %142 {strides = array<i32>} : memref<1x3x16xf32, #tpu.memory_space<vmem>>, vector<1x3x16xf32>,
    return
  }
  func.func @transform_0(%arg0: i32, %arg1: i32) -> (i32, i32, i32) {
    %c0_i32 = arith.constant 0 : i32
    %c0_i32_0 = arith.constant 0 : i32
    return %arg0, %c0_i32, %arg1 : i32, i32, i32
  }
  func.func @transform_1(%arg0: i32, %arg1: i32) -> (i32, i32, i32) {
    %c0_i32 = arith.constant 0 : i32
    %c0_i32_0 = arith.constant 0 : i32
    %c0_i32_1 = arith.constant 0 : i32
    return %arg0, %c0_i32, %c0_i32_0 : i32, i32, i32
  }
  func.func @transform_2(%arg0: i32, %arg1: i32) -> (i32, i32, i32) {
    %c0_i32 = arith.constant 0 : i32
    %c0_i32_0 = arith.constant 0 : i32
    %c0_i32_1 = arith.constant 0 : i32
    return %arg0, %c0_i32, %c0_i32_0 : i32, i32, i32
  }
  func.func @transform_3(%arg0: i32, %arg1: i32) -> (i32, i32, i32) {
    %c0_i32 = arith.constant 0 : i32
    %c0_i32_0 = arith.constant 0 : i32
    return %arg0, %c0_i32, %arg1 : i32, i32, i32
  }
  func.func @transform_4(%arg0: i32, %arg1: i32) -> (i32, i32, i32) {
    %c0_i32 = arith.constant 0 : i32
    %c0_i32_0 = arith.constant 0 : i32
    %c0_i32_1 = arith.constant 0 : i32
    return %arg0, %c0_i32, %c0_i32_0 : i32, i32, i32
  }
  func.func @transform_5(%arg0: i32, %arg1: i32) -> (i32, i32) {
    %c0_i32 = arith.constant 0 : i32
    %c0_i32_0 = arith.constant 0 : i32
    %c0_i32_1 = arith.constant 0 : i32
    return %c0_i32, %c0_i32_0 : i32, i32
  }
  func.func @transform_6(%arg0: i32, %arg1: i32) -> (i32, i32) {
    %c0_i32 = arith.constant 0 : i32
    %c0_i32_0 = arith.constant 0 : i32
    %c0_i32_1 = arith.constant 0 : i32
    return %c0_i32, %c0_i32_0 : i32, i32
  }
  func.func @transform_7(%arg0: i32, %arg1: i32) -> (i32, i32) {
    %c0_i32 = arith.constant 0 : i32
    %c0_i32_0 = arith.constant 0 : i32
    %c0_i32_1 = arith.constant 0 : i32
    return %c0_i32, %c0_i32_0 : i32, i32
  }
  func.func @transform_8(%arg0: i32, %arg1: i32) -> (i32, i32) {
    %c0_i32 = arith.constant 0 : i32
    %c0_i32_0 = arith.constant 0 : i32
    %c0_i32_1 = arith.constant 0 : i32
    return %c0_i32, %c0_i32_0 : i32, i32
  }
  func.func @transform_9(%arg0: i32, %arg1: i32) -> (i32, i32) {
    %c0_i32 = arith.constant 0 : i32
    %c0_i32_0 = arith.constant 0 : i32
    %c0_i32_1 = arith.constant 0 : i32
    return %c0_i32, %c0_i32_0 : i32, i32
  }
  func.func @transform_10(%arg0: i32, %arg1: i32) -> (i32, i32) {
    %c0_i32 = arith.constant 0 : i32
    %c0_i32_0 = arith.constant 0 : i32
    %c0_i32_1 = arith.constant 0 : i32
    return %c0_i32, %c0_i32_0 : i32, i32
  }
  func.func @transform_11(%arg0: i32, %arg1: i32) -> (i32, i32) {
    %c0_i32 = arith.constant 0 : i32
    %c0_i32_0 = arith.constant 0 : i32
    %c0_i32_1 = arith.constant 0 : i32
    return %c0_i32, %c0_i32_0 : i32, i32
  }
  func.func @transform_12(%arg0: i32, %arg1: i32) -> (i32, i32) {
    %c0_i32 = arith.constant 0 : i32
    %c0_i32_0 = arith.constant 0 : i32
    %c0_i32_1 = arith.constant 0 : i32
    return %c0_i32, %c0_i32_0 : i32, i32
  }
  func.func @transform_13(%arg0: i32, %arg1: i32) -> (i32, i32, i32) {
    %c0_i32 = arith.constant 0 : i32
    %c0_i32_0 = arith.constant 0 : i32
    return %arg0, %c0_i32, %arg1 : i32, i32, i32
  }
  func.func @transform_14(%arg0: i32, %arg1: i32) -> (i32, i32, i32) {
    %c0_i32 = arith.constant 0 : i32
    %c0_i32_0 = arith.constant 0 : i32
    return %arg0, %c0_i32, %arg1 : i32, i32, i32
  }
  func.func @transform_15(%arg0: i32, %arg1: i32) -> (i32, i32, i32) {
    %c0_i32 = arith.constant 0 : i32
    %c0_i32_0 = arith.constant 0 : i32
    return %arg0, %c0_i32, %arg1 : i32, i32, i32
  }
}

</mosaic_0001>

<bundles_post_ra>
// kernel: tpu_custom_call.1
= control target key start
LH: loop header
LB: loop body
LE: loop exit
PB: predicated region body
PF: predicated region fallthrough
CT: control target
= control target key end

     0   :  { %s3265_s20 = smov 0   ;;  %s3267_s21 = smov 0   ;;  %s4242_s0 = inlined_call_operand.vmem [shape: f32[2,3,16], index: 0, kind: input, shape index: {}]   ;;  %s4243_s1 = inlined_call_operand.vmem [shape: f32[2,128,3], index: 1, kind: input, shape index: {}]   ;;  %s4244_s2 = inlined_call_operand.vmem [shape: f32[2,8,128], index: 2, kind: input, shape index: {}]   ;;  %s4245_s3 = inlined_call_operand.vmem [shape: f32[2,4,16], index: 3, kind: input, shape index: {}]   ;;  %s4246_s4 = inlined_call_operand.vmem [shape: f32[2,4,128], index: 4, kind: input, shape index: {}]   ;;  %s4247_s5 = inlined_call_operand.vmem [shape: f32[4,4], index: 5, kind: input, shape index: {}]   ;;  %s4248_s6 = inlined_call_operand.vmem [shape: f32[4,4], index: 6, kind: input, shape index: {}]   ;;  %s4249_s7 = inlined_call_operand.vmem [shape: f32[4,1], index: 7, kind: input, shape index: {}]   ;;  %s4250_s8 = inlined_call_operand.vmem [shape: f32[4,1], index: 8, kind: input, shape index: {}]   ;;  %s4251_s9 = inlined_call_operand.<no memory space> [shape: f32[1,1], index: 9, kind: input, shape index: {}]   ;;  %s4252_s10 = inlined_call_operand.vmem [shape: f32[32,8], index: 10, kind: input, shape index: {}]   ;;  %s4253_s11 = inlined_call_operand.vmem [shape: f32[32,4], index: 11, kind: input, shape index: {}]   ;;  %s4254_s12 = inlined_call_operand.vmem [shape: f32[32,1], index: 12, kind: input, shape index: {}]   ;;  %s4255_s13 = inlined_call_operand.vmem [shape: f32[2,32,16], index: 13, kind: output, shape index: {0}]   ;;  %s4256_s14 = inlined_call_operand.vmem [shape: s32[2,3,16], index: 14, kind: output, shape index: {1}]   ;;  %s4257_s15 = inlined_call_operand.vmem [shape: f32[2,3,16], index: 15, kind: output, shape index: {2}]  }
   0x1   :  { %v21_v0 = vstv %s4251_s9  ;;  %s3269_s22 = smov 0  }
   0x2   :  { %22 = vst [vmem:[#allocation2] sm:$0x1] %v21_v0 }
   0x3 LB: > { %s40_s9 = sadd.s32 1, %s3168_s21  ;;  %p2654_p0 = scmp.ge.s32.totalorder %s3172_s22, 1  ;;  %s3172_s22 = sphi %s3269_s22, %s28_s22   ;;  %s3168_s21 = sphi %s3267_s21, %s4341_s21   ;;  %s3164_s20 = sphi %s3265_s20, %s4340_s20  }
   0x4   : > { %p42_p1 = scmp.ge.s32.totalorder %s40_s9, 2  ;;  %p508_p2 = scmp.lt.s32.totalorder %s3172_s22, 3 }
   0x6   : > { %s4343_s9 = smov (%p42_p1, %s40_s9), 0  ;;  %p509_p3 = pnand %p2654_p0, %p508_p2 }
   0x7   : > { %p595_p4 = scmp.lt.s32.totalorder (!%p509_p3), %s3164_s20, 1  ;;  %vm786_vm0 = vcmask (!%p509_p3), 1042432   ;;  %vm680_vm1 = vcmask (!%p509_p3), 23552   ;;  %v3174_v6 = vmov (!%p509_p3), 0.0   ;;  %vm4259_vm2 = vcmask (!%p509_p3), 1043456   ;;  %s3176_s16 = smov (!%p509_p3), 16  }
   0x8   : > { %512 = sbr.rel (%p509_p3) target bundleno = 1388 (0x56c), region = 72  ;;  %2883 = vmatprep.subr.mxu1 (!%p509_p3), %v3174_v6  ;;  %vm3175_vm3 = vmmov (!%p509_p3), 0   ;;  %v1581_v8 = vld [vmem:[%s4247_s5] sm:$0xf] (!%p509_p3)  ;;  %vm4258_vm4 = vcmask (!%p509_p3), 31744   ;;  %vm730_vm5 = vcmask (!%p509_p3), 124928   ;;  %v983_v26 = vlaneseq (!%p509_p3) }
   0x9   : > { %2885 = vmatprep.mubr.msk.f32.mxu1 (!%p509_p3), %vm3175_vm3, %v3174_v6  ;;  %v1660_v10 = vld [vmem:[%s4248_s6] sm:$0xf] (!%p509_p3)  ;;  %vm1032_vm6 = vcmask (!%p509_p3), 130048   ;;  %s3178_s17 = smov (!%p509_p3), 32   ;;  %s3180_s29 = smov (!%p509_p3), 96  }
   0xa   : > { %v3337_v29 = vshrl.u32 (!%p509_p3), %v983_v26, 7 }
   0xc   : > { %v3340_v32 = vadd.s32 (!%p509_p3), 8, %v3337_v29  ;;  %v3343_v33 = vadd.s32 (!%p509_p3), 16, %v3337_v29  ;;  %v3346_v35 = vadd.s32 (!%p509_p3), 24, %v3337_v29  ;;  %v3349_v36 = vadd.s32 (!%p509_p3), 32, %v3337_v29 }
   0xd   : > { %v3352_v37 = vadd.s32 (!%p509_p3), 40, %v3337_v29  ;;  %v3355_v38 = vadd.s32 (!%p509_p3), 48, %v3337_v29  ;;  %v3358_v39 = vadd.s32 (!%p509_p3), 56, %v3337_v29  ;;  %v3361_v40 = vadd.s32 (!%p509_p3), 64, %v3337_v29 }
   0xe   : > { %v3364_v41 = vadd.s32 (!%p509_p3), 72, %v3337_v29  ;;  %v3367_v43 = vadd.s32 (!%p509_p3), 80, %v3337_v29  ;;  %v3370_v44 = vadd.s32 (!%p509_p3), 88, %v3337_v29  ;;  %v3373_v45 = vadd.s32 (!%p509_p3), 96, %v3337_v29 }
   0xf   : > { %s4345_s20 = smov (!%p595_p4, %s3164_s20), 1  ;;  %v3376_v46 = vadd.s32 104, %v3337_v29  ;;  %v3379_v47 = vadd.s32 112, %v3337_v29  ;;  %v3382_v48 = vadd.s32 120, %v3337_v29 }
  0x10   : > { %s3286_s23 = sshll.u32 %s4345_s20, 2  ;;  %s2790_s24 = sshll.u32 %s4345_s20, 7 }
  0x11   : > { %s601_s27 = scalar_lea.vmem %s4242_s0, %s3286_s23  ;;  %s3296_s30 = scalar_lea.vmem %s4243_s1, %s2790_s24 }
  0x12   : > { %v644_v1 = vld [vmem:[%s601_s27] sm:$0x7]  ;;  %v646_v3 = vld [vmem:[%s3296_s30 + $0x8] sm:$0xff]  ;;  %s621_s18 = scalar_lea.vmem %s4246_s4, %s3286_s23  ;;  %s3320_s27 = scalar_lea.vmem %s4245_s3, %s3286_s23 }
  0x13   : > { %v645_v2 = vld [vmem:[%s3296_s30] sm:$0xff]  ;;  %2857 = vmatprep.subr.msk.mxu0 %vm786_vm0, %v644_v1  ;;  %v729_v11 = vmul.f32 %v644_v1, %v644_v1  ;;  %s636_s24 = scalar_lea.vmem %s4256_s14, %s3286_s23 }
  0x14   : > { %v664_v4 = vmul.f32 %v645_v2, %v645_v2  ;;  %2859 = vmatprep.mubr.msk.f32.mxu0 %vm680_vm1, %v645_v2  ;;  %2858 = vmatpush3.msk.msra.mxu0 %vm786_vm0, %v644_v1  ;;  %v663_v7 = vld [vmem:[%s621_s18] sm:$0xf] }
  0x15   : > { %2860 = vmatmul.mubr.msk.f32.vlgmr.msra.gmra.mrb[0].mxu0 %vm680_vm1, %v646_v3  ;;  %2884 = vmatpush3.msk.msra.mxu1 %vm4259_vm2, %v663_v7  ;;  %v662_v9 = vld [vmem:[%s3320_s27] sm:$0xf]  ;;  %v731_v12 = vsel %vm730_vm5, %v729_v11, 0.0 }
  0x16   : > { %v681_v5 = vsel %vm680_vm1, %v664_v4, 0.0  ;;  %2886 = vmatmul.mubr.msk.f32.vlgmr.msra.gmra.mrb[0].mxu1 %vm4258_vm4, %v1581_v8  ;;  %2888 = vmatprep.subr.mxu1 %v3174_v6  ;;  %v732_v13 = vrot.slane %v731_v12, 4 }
  0x17   : > { %682 = vadd.xlane.f32.xlu0 %v681_v5  ;;  %2890 = vmatprep.mubr.msk.f32.mxu1 %vm3175_vm3, %v3174_v6 }
  0x18   : > { %2889 = vmatpush3.msk.msra.mxu1 %vm4259_vm2, %v662_v9  ;;  %v733_v14 = vadd.f32 %v732_v13, %v731_v12 }
  0x1a   : > { %2891 = vmatmul.mubr.msk.f32.vlgmr.msra.gmra.mrb[2].mxu1 %vm4258_vm4, %v1660_v10  ;;  %v734_v15 = vrot.slane %v733_v14, 2 }
  0x1b   : > { %2960 = vmatprep.mubr.msk.f32.mxu1 %vm3175_vm3, %v3174_v6 }
  0x1c   : > { %v735_v16 = vadd.f32 %v734_v15, %v733_v14 }
  0x1e   : > { %v736_v17 = vrot.slane %v735_v16, 1 }
  0x20   : > { %v737_v18 = vadd.f32 %v736_v17, %v735_v16 }
  0xa4   : > { %v683_v19 = vpop.xlane.xlu0 %682 }
  0xa5   : > { %v935_v21 = vadd.f32 %v737_v18, %v683_v19 }
  0xe8   : > { %v2861_v20 = vpop.f32.mrb[0].mxu0 }
  0xe9   : > { %v856_v22 = vpop.f32.mrb[1].mxu0 }
  0xea   : > { %v951_v23 = vmul.f32 2.0, %v856_v22 }
  0xec   : > { %v3333_v24 = vsub.f32 %v935_v21, %v951_v23 }
  0xee   : > { %v1033_v25 = vsel %vm1032_vm6, %v3333_v24, inf }
  0xef   : > { %v1064_v27 = vrot.slane %v1033_v25, 4 }
  0xf1   : > { %v1065_v28 = vmin.f32 %v1033_v25, %v1064_v27 }
  0xf3   : > { %v1066_v30 = vrot.slane %v1065_v28, 2 }
  0xf5   : > { %v1067_v31 = vmin.f32 %v1065_v28, %v1066_v30 }
  0xf7   : > { %v1068_v34 = vrot.slane %v1067_v31, 1 }
  0xf9   : > { %v1069_v42 = vmin.f32 %v1067_v31, %v1068_v34 }
  0xfb   : > { %vm1070_vm7 = vcmp.le.f32.partialorder %v3333_v24, %v1069_v42  ;;  %vm2682_vm8 = vcmp.ge.f32.partialorder %v1069_v42, inf }
  0xfc   : > { %v1086_v49 = vsel %vm1070_vm7, %v3337_v29, 128  ;;  %v1087_v50 = vsel %vm2682_vm8, %v3340_v32, 128  ;;  %v1088_v51 = vsel %vm2682_vm8, %v3343_v33, 128  ;;  %v1089_v52 = vsel %vm2682_vm8, %v3346_v35, 128 }
  0xfd   : > { %v1090_v53 = vsel %vm2682_vm8, %v3349_v36, 128  ;;  %v1091_v54 = vsel %vm2682_vm8, %v3352_v37, 128  ;;  %v1092_v55 = vsel %vm2682_vm8, %v3355_v38, 128  ;;  %v1093_v56 = vsel %vm2682_vm8, %v3358_v39, 128 }
  0xfe   : > { %v1094_v57 = vsel %vm2682_vm8, %v3361_v40, 128  ;;  %v1095_v58 = vsel %vm2682_vm8, %v3364_v41, 128  ;;  %v1096_v59 = vsel %vm2682_vm8, %v3367_v43, 128  ;;  %v1097_v60 = vsel %vm2682_vm8, %v3370_v44, 128 }
  0xff   : > { %v1098_v61 = vsel %vm2682_vm8, %v3373_v45, 128  ;;  %v1099_v62 = vsel %vm2682_vm8, %v3376_v46, 128  ;;  %v1100_v63 = vsel %vm2682_vm8, %v3379_v47, 128  ;;  %v1101_v0 = vsel %vm2682_vm8, %v3382_v48, 128 }
 0x100   : > { %v1102_v1 = vsel %vm1032_vm6, %v1086_v49, 2147483647  ;;  %v1103_v2 = vsel %vm1032_vm6, %v1087_v50, 2147483647  ;;  %v1104_v3 = vsel %vm1032_vm6, %v1088_v51, 2147483647 }
 0x101   : > { %v1105_v4 = vsel %vm1032_vm6, %v1089_v52, 2147483647  ;;  %v1106_v5 = vsel %vm1032_vm6, %v1090_v53, 2147483647  ;;  %v1109_v7 = vsel %vm1032_vm6, %v1091_v54, 2147483647 }
 0x102   : > { %vm1107_vm9 = vcmp.lt.s32.totalorder %v1102_v1, %v1106_v5  ;;  %vm1110_vm10 = vcmp.lt.s32.totalorder %v1103_v2, %v1109_v7  ;;  %v1112_v8 = vsel %vm1032_vm6, %v1092_v55, 2147483647  ;;  %v1115_v9 = vsel %vm1032_vm6, %v1093_v56, 2147483647 }
 0x103   : > { %v1108_v10 = vsel %vm1107_vm9, %v1102_v1, %v1106_v5  ;;  %v1111_v11 = vsel %vm1110_vm10, %v1103_v2, %v1109_v7  ;;  %vm1113_vm11 = vcmp.lt.s32.totalorder %v1104_v3, %v1112_v8  ;;  %vm1116_vm12 = vcmp.lt.s32.totalorder %v1105_v4, %v1115_v9 }
 0x104   : > { %v1114_v12 = vsel %vm1113_vm11, %v1104_v3, %v1112_v8  ;;  %v1117_v13 = vsel %vm1116_vm12, %v1105_v4, %v1115_v9  ;;  %v1118_v14 = vsel %vm1032_vm6, %v1094_v57, 2147483647  ;;  %v1121_v15 = vsel %vm1032_vm6, %v1095_v58, 2147483647 }
 0x105   : > { %vm1119_vm13 = vcmp.lt.s32.totalorder %v1108_v10, %v1118_v14  ;;  %vm1122_vm14 = vcmp.lt.s32.totalorder %v1111_v11, %v1121_v15  ;;  %v1124_v16 = vsel %vm1032_vm6, %v1096_v59, 2147483647  ;;  %v1127_v17 = vsel %vm1032_vm6, %v1097_v60, 2147483647 }
 0x106   : > { %v1120_v18 = vsel %vm1119_vm13, %v1108_v10, %v1118_v14  ;;  %v1123_v19 = vsel %vm1122_vm14, %v1111_v11, %v1121_v15  ;;  %vm1125_vm15 = vcmp.lt.s32.totalorder %v1114_v12, %v1124_v16  ;;  %vm1128_vm0 = vcmp.lt.s32.totalorder %v1117_v13, %v1127_v17 }
 0x107   : > { %v1126_v20 = vsel %vm1125_vm15, %v1114_v12, %v1124_v16  ;;  %v1129_v21 = vsel %vm1128_vm0, %v1117_v13, %v1127_v17  ;;  %v1130_v22 = vsel %vm1032_vm6, %v1098_v61, 2147483647  ;;  %v1133_v23 = vsel %vm1032_vm6, %v1099_v62, 2147483647 }
 0x108   : > { %vm1131_vm7 = vcmp.lt.s32.totalorder %v1120_v18, %v1130_v22  ;;  %vm1134_vm8 = vcmp.lt.s32.totalorder %v1123_v19, %v1133_v23  ;;  %v1136_v25 = vsel %vm1032_vm6, %v1100_v63, 2147483647  ;;  %v1139_v26 = vsel %vm1032_vm6, %v1101_v0, 2147483647 }
 0x109   : > { %v1132_v27 = vsel %vm1131_vm7, %v1120_v18, %v1130_v22  ;;  %v1135_v28 = vsel %vm1134_vm8, %v1123_v19, %v1133_v23  ;;  %vm1137_vm9 = vcmp.lt.s32.totalorder %v1126_v20, %v1136_v25  ;;  %vm1140_vm10 = vcmp.lt.s32.totalorder %v1129_v21, %v1139_v26 }
 0x10a   : > { %v1138_v30 = vsel %vm1137_vm9, %v1126_v20, %v1136_v25  ;;  %v1141_v31 = vsel %vm1140_vm10, %v1129_v21, %v1139_v26  ;;  %vm1142_vm11 = vcmp.lt.s32.totalorder %v1132_v27, %v1135_v28 }
 0x10b   : > { %v1143_v34 = vsel %vm1142_vm11, %v1132_v27, %v1135_v28  ;;  %vm1144_vm12 = vcmp.lt.s32.totalorder %v1138_v30, %v1141_v31 }
 0x10c   : > { %v1145_v42 = vsel %vm1144_vm12, %v1138_v30, %v1141_v31 }
 0x10d   : > { %vm1146_vm13 = vcmp.lt.s32.totalorder %v1143_v34, %v1145_v42 }
 0x10e   : > { %v1147_v49 = vsel %vm1146_vm13, %v1143_v34, %v1145_v42 }
 0x10f   : > { %v1148_v50 = vrot.slane %v1147_v49, 4 }
 0x111   : > { %vm1149_vm14 = vcmp.lt.s32.totalorder %v1147_v49, %v1148_v50 }
 0x112   : > { %v1150_v51 = vsel %vm1149_vm14, %v1147_v49, %v1148_v50 }
 0x113   : > { %v1151_v52 = vrot.slane %v1150_v51, 2 }
 0x115   : > { %vm1152_vm15 = vcmp.lt.s32.totalorder %v1150_v51, %v1151_v52 }
 0x116   : > { %v1153_v53 = vsel %vm1152_vm15, %v1150_v51, %v1151_v52 }
 0x117   : > { %v1154_v54 = vrot.slane %v1153_v53, 1 }
 0x119   : > { %vm1155_vm0 = vcmp.lt.s32.totalorder %v1153_v53, %v1154_v54 }
 0x11a   : > { %v3432_v55 = vsel %vm1155_vm0, %v1153_v53, %v1154_v54 }
 0x11b   : > { %vm1157_vm7 = vcmp.eq.s32.totalorder %v3337_v29, %v3432_v55 }
 0x11c   : > { %v3440_v56 = vsel %vm1157_vm7, inf, %v3333_v24 }
 0x11d   : > { %v1221_v57 = vsel %vm1032_vm6, %v3440_v56, inf }
 0x11e   : > { %v1252_v58 = vrot.slane %v1221_v57, 4 }
 0x120   : > { %v1253_v59 = vmin.f32 %v1221_v57, %v1252_v58 }
 0x122   : > { %v1254_v60 = vrot.slane %v1253_v59, 2 }
 0x124   : > { %v1255_v61 = vmin.f32 %v1253_v59, %v1254_v60 }
 0x126   : > { %v1256_v62 = vrot.slane %v1255_v61, 1 }
 0x128   : > { %v1257_v63 = vmin.f32 %v1255_v61, %v1256_v62 }
 0x12a   : > { %vm1258_vm8 = vcmp.le.f32.partialorder %v3440_v56, %v1257_v63  ;;  %vm2713_vm9 = vcmp.ge.f32.partialorder %v1257_v63, inf }
 0x12b   : > { %v1274_v0 = vsel %vm1258_vm8, %v3337_v29, 128  ;;  %v1275_v1 = vsel %vm2713_vm9, %v3340_v32, 128  ;;  %v1276_v24 = vsel %vm2713_vm9, %v3343_v33, 128  ;;  %v1277_v2 = vsel %vm2713_vm9, %v3346_v35, 128 }
 0x12c   : > { %v1278_v3 = vsel %vm2713_vm9, %v3349_v36, 128  ;;  %v1279_v4 = vsel %vm2713_vm9, %v3352_v37, 128  ;;  %v1280_v5 = vsel %vm2713_vm9, %v3355_v38, 128  ;;  %v1281_v7 = vsel %vm2713_vm9, %v3358_v39, 128 }
 0x12d   : > { %v1282_v8 = vsel %vm2713_vm9, %v3361_v40, 128  ;;  %v1283_v9 = vsel %vm2713_vm9, %v3364_v41, 128  ;;  %v1284_v10 = vsel %vm2713_vm9, %v3367_v43, 128  ;;  %v1285_v11 = vsel %vm2713_vm9, %v3370_v44, 128 }
 0x12e   : > { %v1286_v12 = vsel %vm2713_vm9, %v3373_v45, 128  ;;  %v1287_v13 = vsel %vm2713_vm9, %v3376_v46, 128  ;;  %v1288_v14 = vsel %vm2713_vm9, %v3379_v47, 128  ;;  %v1289_v15 = vsel %vm2713_vm9, %v3382_v48, 128 }
 0x12f   : > { %v1290_v16 = vsel %vm1032_vm6, %v1274_v0, 2147483647  ;;  %v1291_v17 = vsel %vm1032_vm6, %v1275_v1, 2147483647  ;;  %v1292_v18 = vsel %vm1032_vm6, %v1276_v24, 2147483647 }
 0x130   : > { %v1293_v19 = vsel %vm1032_vm6, %v1277_v2, 2147483647  ;;  %v1294_v20 = vsel %vm1032_vm6, %v1278_v3, 2147483647  ;;  %v1297_v21 = vsel %vm1032_vm6, %v1279_v4, 2147483647 }
 0x131   : > { %vm1295_vm10 = vcmp.lt.s32.totalorder %v1290_v16, %v1294_v20  ;;  %vm1298_vm11 = vcmp.lt.s32.totalorder %v1291_v17, %v1297_v21  ;;  %v1300_v22 = vsel %vm1032_vm6, %v1280_v5, 2147483647  ;;  %v1303_v23 = vsel %vm1032_vm6, %v1281_v7, 2147483647 }
 0x132   : > { %v1296_v25 = vsel %vm1295_vm10, %v1290_v16, %v1294_v20  ;;  %v1299_v26 = vsel %vm1298_vm11, %v1291_v17, %v1297_v21  ;;  %vm1301_vm12 = vcmp.lt.s32.totalorder %v1292_v18, %v1300_v22  ;;  %vm1304_vm13 = vcmp.lt.s32.totalorder %v1293_v19, %v1303_v23 }
 0x133   : > { %v1302_v27 = vsel %vm1301_vm12, %v1292_v18, %v1300_v22  ;;  %v1305_v28 = vsel %vm1304_vm13, %v1293_v19, %v1303_v23  ;;  %v1306_v30 = vsel %vm1032_vm6, %v1282_v8, 2147483647  ;;  %v1309_v31 = vsel %vm1032_vm6, %v1283_v9, 2147483647 }
 0x134   : > { %vm1307_vm14 = vcmp.lt.s32.totalorder %v1296_v25, %v1306_v30  ;;  %vm1310_vm15 = vcmp.lt.s32.totalorder %v1299_v26, %v1309_v31  ;;  %v1312_v34 = vsel %vm1032_vm6, %v1284_v10, 2147483647  ;;  %v1315_v42 = vsel %vm1032_vm6, %v1285_v11, 2147483647 }
 0x135   : > { %v1308_v49 = vsel %vm1307_vm14, %v1296_v25, %v1306_v30  ;;  %v1311_v50 = vsel %vm1310_vm15, %v1299_v26, %v1309_v31  ;;  %vm1313_vm0 = vcmp.lt.s32.totalorder %v1302_v27, %v1312_v34  ;;  %vm1316_vm8 = vcmp.lt.s32.totalorder %v1305_v28, %v1315_v42 }
 0x136   : > { %v1314_v51 = vsel %vm1313_vm0, %v1302_v27, %v1312_v34  ;;  %v1317_v52 = vsel %vm1316_vm8, %v1305_v28, %v1315_v42  ;;  %v1318_v53 = vsel %vm1032_vm6, %v1286_v12, 2147483647  ;;  %v1321_v54 = vsel %vm1032_vm6, %v1287_v13, 2147483647 }
 0x137   : > { %vm1319_vm9 = vcmp.lt.s32.totalorder %v1308_v49, %v1318_v53  ;;  %vm1322_vm10 = vcmp.lt.s32.totalorder %v1311_v50, %v1321_v54  ;;  %v1324_v57 = vsel %vm1032_vm6, %v1288_v14, 2147483647  ;;  %v1327_v58 = vsel %vm1032_vm6, %v1289_v15, 2147483647 }
 0x138   : > { %v1320_v59 = vsel %vm1319_vm9, %v1308_v49, %v1318_v53  ;;  %v1323_v60 = vsel %vm1322_vm10, %v1311_v50, %v1321_v54  ;;  %vm1325_vm11 = vcmp.lt.s32.totalorder %v1314_v51, %v1324_v57  ;;  %vm1328_vm12 = vcmp.lt.s32.totalorder %v1317_v52, %v1327_v58 }
 0x139   : > { %v1326_v61 = vsel %vm1325_vm11, %v1314_v51, %v1324_v57  ;;  %v1329_v62 = vsel %vm1328_vm12, %v1317_v52, %v1327_v58  ;;  %vm1330_vm13 = vcmp.lt.s32.totalorder %v1320_v59, %v1323_v60 }
 0x13a   : > { %v1331_v63 = vsel %vm1330_vm13, %v1320_v59, %v1323_v60  ;;  %vm1332_vm14 = vcmp.lt.s32.totalorder %v1326_v61, %v1329_v62 }
 0x13b   : > { %v1333_v0 = vsel %vm1332_vm14, %v1326_v61, %v1329_v62 }
 0x13c   : > { %vm1334_vm15 = vcmp.lt.s32.totalorder %v1331_v63, %v1333_v0 }
 0x13d   : > { %v1335_v1 = vsel %vm1334_vm15, %v1331_v63, %v1333_v0 }
 0x13e   : > { %v1336_v24 = vrot.slane %v1335_v1, 4 }
 0x140   : > { %vm1337_vm0 = vcmp.lt.s32.totalorder %v1335_v1, %v1336_v24 }
 0x141   : > { %v1338_v2 = vsel %vm1337_vm0, %v1335_v1, %v1336_v24 }
 0x142   : > { %v1339_v3 = vrot.slane %v1338_v2, 2 }
 0x144   : > { %vm1340_vm8 = vcmp.lt.s32.totalorder %v1338_v2, %v1339_v3 }
 0x145   : > { %v1341_v4 = vsel %vm1340_vm8, %v1338_v2, %v1339_v3 }
 0x146   : > { %v1342_v5 = vrot.slane %v1341_v4, 1 }
 0x148   : > { %vm1343_vm4 = vcmp.lt.s32.totalorder %v1341_v4, %v1342_v5 }
 0x149   : > { %v3492_v7 = vsel %vm1343_vm4, %v1341_v4, %v1342_v5 }
 0x14a   : > { %vm4273_vm9 = vcmp.eq.s32.totalorder %v3343_v33, %v3492_v7  ;;  %vm4272_vm10 = vcmp.eq.s32.totalorder %v3346_v35, %v3492_v7  ;;  %vm1345_vm11 = vcmp.eq.s32.totalorder %v3337_v29, %v3492_v7  ;;  %vm4274_vm12 = vcmp.eq.s32.totalorder %v3340_v32, %v3492_v7 }
 0x14b   : > { %v2730_v8 = vsel %vm4273_vm9, 1.0, %v3174_v6  ;;  %v2731_v9 = vsel %vm4272_vm10, 1.0, %v3174_v6  ;;  %v2728_v10 = vsel %vm1345_vm11, 1.0, %v3174_v6  ;;  %v2729_v11 = vsel %vm4274_vm12, 1.0, %v3174_v6 }
 0x14c   : > { %v3068_v12 = vpack.i.bf16 %v2731_v9, %v2730_v8  ;;  %v3063_v13 = vpack.i.bf16 %v2729_v11, %v2728_v10  ;;  %v1361_v14 = vsel %vm1345_vm11, inf, %v3440_v56  ;;  %vm4265_vm4 = vcmp.eq.s32.totalorder %v3349_v36, %v3492_v7 }
 0x14d   : > { %v1409_v15 = vsel %vm1032_vm6, %v1361_v14, inf  ;;  %vm4262_vm13 = vcmp.eq.s32.totalorder %v3352_v37, %v3492_v7  ;;  %v2732_v16 = vsel %vm4265_vm4, 1.0, %v3174_v6  ;;  %vm4261_vm14 = vcmp.eq.s32.totalorder %v3361_v40, %v3492_v7 }
 0x14e   : > { %3069 = vrot.lane.b32.xlu1 %v3068_v12, %s3176_s16  ;;  %3064 = vrot.lane.b32.xlu0 %v3063_v13, %s3176_s16  ;;  %v1440_v56 = vrot.slane %v1409_v15, 4  ;;  %v2733_v17 = vsel %vm4262_vm13, 1.0, %v3174_v6  ;;  %vm4260_vm15 = vcmp.eq.s32.totalorder %v3364_v41, %v3492_v7  ;;  %v2736_v18 = vsel %vm4261_vm14, 1.0, %v3174_v6 }
 0x14f   : > { %v3073_v19 = vpack.i.bf16 %v2733_v17, %v2732_v16  ;;  %v2737_v20 = vsel %vm4260_vm15, 1.0, %v3174_v6  ;;  %vm4264_vm0 = vcmp.eq.s32.totalorder %v3355_v38, %v3492_v7  ;;  %vm4263_vm8 = vcmp.eq.s32.totalorder %v3358_v39, %v3492_v7 }
 0x150   : > { %v1441_v21 = vmin.f32 %v1409_v15, %v1440_v56  ;;  %v3083_v22 = vpack.i.bf16 %v2737_v20, %v2736_v18  ;;  %v2734_v23 = vsel %vm4264_vm0, 1.0, %v3174_v6  ;;  %v2735_v25 = vsel %vm4263_vm8, 1.0, %v3174_v6 }
 0x151   : > { %vm4271_vm2 = vcmp.eq.s32.totalorder %v3367_v43, %v3492_v7  ;;  %vm4270_vm15 = vcmp.eq.s32.totalorder %v3370_v44, %v3492_v7  ;;  %vm4267_vm14 = vcmp.eq.s32.totalorder %v3373_v45, %v3492_v7  ;;  %vm2429_vm13 = vcmask 1040384  }
 0x152   : > { %v1442_v26 = vrot.slane %v1441_v21, 2  ;;  %3074 = vrot.lane.b32.xlu1 %v3073_v19, %s3176_s16  ;;  %3084 = vrot.lane.b32.xlu0 %v3083_v22, %s3176_s16  ;;  %v2738_v27 = vsel %vm4271_vm2, 1.0, %v3174_v6  ;;  %v2739_v28 = vsel %vm4270_vm15, 1.0, %v3174_v6  ;;  %vm4266_vm8 = vcmp.eq.s32.totalorder %v3376_v46, %v3492_v7 }
 0x153   : > { %v3078_v30 = vpack.i.bf16 %v2735_v25, %v2734_v23  ;;  %v3088_v34 = vpack.i.bf16 %v2739_v28, %v2738_v27  ;;  %vm4269_vm0 = vcmp.eq.s32.totalorder %v3379_v47, %v3492_v7  ;;  %vm4268_vm4 = vcmp.eq.s32.totalorder %v3382_v48, %v3492_v7 }
 0x154   : > { %v1443_v31 = vmin.f32 %v1441_v21, %v1442_v26  ;;  %v2740_v42 = vsel %vm4267_vm14, 1.0, %v3174_v6  ;;  %v2741_v49 = vsel %vm4266_vm8, 1.0, %v3174_v6  ;;  %v3594_v50 = vsel %vm2429_vm13, %v3432_v55, %v3492_v7 }
 0x155   : > { %v2742_v52 = vsel %vm4269_vm0, 1.0, %v3174_v6  ;;  %v2743_v53 = vsel %vm4268_vm4, 1.0, %v3174_v6  ;;  %v3093_v57 = vpack.i.bf16 %v2741_v49, %v2740_v42 }
 0x156   : > { %v1444_v51 = vrot.slane %v1443_v31, 1  ;;  %3079 = vrot.lane.b32.xlu1 %v3078_v30, %s3176_s16  ;;  %3089 = vrot.lane.b32.xlu0 %v3088_v34, %s3176_s16  ;;  %v3098_v58 = vpack.i.bf16 %v2743_v53, %v2742_v52 }
 0x158   : > { %v1445_v54 = vmin.f32 %v1443_v31, %v1444_v51 }
 0x15a   : > { %vm1446_vm8 = vcmp.le.f32.partialorder %v1361_v14, %v1445_v54  ;;  %vm2744_vm14 = vcmp.ge.f32.partialorder %v1445_v54, inf  ;;  %3094 = vrot.lane.b32.xlu0 %v3093_v57, %s3176_s16 }
 0x15b   : > { %v1462_v59 = vsel %vm1446_vm8, %v3337_v29, 128  ;;  %v1463_v60 = vsel %vm2744_vm14, %v3340_v32, 128  ;;  %v1464_v61 = vsel %vm2744_vm14, %v3343_v33, 128  ;;  %v1465_v62 = vsel %vm2744_vm14, %v3346_v35, 128 }
 0x15c   : > { %v1466_v63 = vsel %vm2744_vm14, %v3349_v36, 128  ;;  %v1467_v0 = vsel %vm2744_vm14, %v3352_v37, 128  ;;  %v1468_v1 = vsel %vm2744_vm14, %v3355_v38, 128  ;;  %v1469_v24 = vsel %vm2744_vm14, %v3358_v39, 128 }
 0x15d   : > { %v1470_v2 = vsel %vm2744_vm14, %v3361_v40, 128  ;;  %v1471_v3 = vsel %vm2744_vm14, %v3364_v41, 128  ;;  %v1472_v4 = vsel %vm2744_vm14, %v3367_v43, 128  ;;  %v1473_v5 = vsel %vm2744_vm14, %v3370_v44, 128 }
 0x15e   : > { %v1474_v8 = vsel %vm2744_vm14, %v3373_v45, 128  ;;  %v1475_v9 = vsel %vm2744_vm14, %v3376_v46, 128  ;;  %v1476_v10 = vsel %vm2744_vm14, %v3379_v47, 128  ;;  %v1477_v11 = vsel %vm2744_vm14, %v3382_v48, 128  ;;  %3099 = vrot.lane.b32.xlu0 %v3098_v58, %s3176_s16 }
 0x15f   : > { %v1478_v12 = vsel %vm1032_vm6, %v1462_v59, 2147483647  ;;  %v1479_v13 = vsel %vm1032_vm6, %v1463_v60, 2147483647  ;;  %v1480_v14 = vsel %vm1032_vm6, %v1464_v61, 2147483647 }
 0x160   : > { %v1481_v15 = vsel %vm1032_vm6, %v1465_v62, 2147483647  ;;  %v1482_v16 = vsel %vm1032_vm6, %v1466_v63, 2147483647  ;;  %v1485_v56 = vsel %vm1032_vm6, %v1467_v0, 2147483647 }
 0x161   : > { %vm1483_vm8 = vcmp.lt.s32.totalorder %v1478_v12, %v1482_v16  ;;  %vm1486_vm4 = vcmp.lt.s32.totalorder %v1479_v13, %v1485_v56  ;;  %v1488_v17 = vsel %vm1032_vm6, %v1468_v1, 2147483647  ;;  %v1491_v18 = vsel %vm1032_vm6, %v1469_v24, 2147483647 }
 0x162   : > { %v1484_v19 = vsel %vm1483_vm8, %v1478_v12, %v1482_v16  ;;  %v1487_v20 = vsel %vm1486_vm4, %v1479_v13, %v1485_v56  ;;  %vm1489_vm14 = vcmp.lt.s32.totalorder %v1480_v14, %v1488_v17  ;;  %vm1492_vm0 = vcmp.lt.s32.totalorder %v1481_v15, %v1491_v18 }
 0x163   : > { %v1490_v21 = vsel %vm1489_vm14, %v1480_v14, %v1488_v17  ;;  %v1493_v22 = vsel %vm1492_vm0, %v1481_v15, %v1491_v18  ;;  %v1494_v23 = vsel %vm1032_vm6, %v1470_v2, 2147483647  ;;  %v1497_v25 = vsel %vm1032_vm6, %v1471_v3, 2147483647  ;;  %v647_v2 = vld [vmem:[%s3296_s30 + $0x10] sm:$0xff]  ;;  %v648_v3 = vld [vmem:[%s3296_s30 + $0x18] sm:$0xff] }
 0x164   : > { %vm1495_vm15 = vcmp.lt.s32.totalorder %v1484_v19, %v1494_v23  ;;  %vm1498_vm2 = vcmp.lt.s32.totalorder %v1487_v20, %v1497_v25  ;;  %v1500_v26 = vsel %vm1032_vm6, %v1472_v4, 2147483647  ;;  %v1503_v27 = vsel %vm1032_vm6, %v1473_v5, 2147483647  ;;  %v3657_v4 = vpop.f32.mrb[0].mxu1  ;;  %2862 = vmatprep.mubr.msk.f32.mxu0 %vm680_vm1, %v647_v2  ;;  %v649_v14 = vld [vmem:[%s3296_s30 + $0x20] sm:$0xff] }
 0x165   : > { %v1496_v28 = vsel %vm1495_vm15, %v1484_v19, %v1494_v23  ;;  %v1499_v30 = vsel %vm1498_vm2, %v1487_v20, %v1497_v25  ;;  %vm1501_vm10 = vcmp.lt.s32.totalorder %v1490_v21, %v1500_v26  ;;  %vm1504_vm9 = vcmp.lt.s32.totalorder %v1493_v22, %v1503_v27  ;;  %2863 = vmatmul.mubr.msk.f32.gmra.mrb[2].mxu0 %vm680_vm1, %v648_v3  ;;  %v650_v15 = vld [vmem:[%s3296_s30 + $0x28] sm:$0xff]  ;;  %v651_v19 = vld [vmem:[%s3296_s30 + $0x30] sm:$0xff]  ;;  %v652_v20 = vld [vmem:[%s3296_s30 + $0x38] sm:$0xff] }
 0x166   : > { %v1502_v31 = vsel %vm1501_vm10, %v1490_v21, %v1500_v26  ;;  %v1505_v34 = vsel %vm1504_vm9, %v1493_v22, %v1503_v27  ;;  %v1506_v42 = vsel %vm1032_vm6, %v1474_v8, 2147483647  ;;  %v1509_v49 = vsel %vm1032_vm6, %v1475_v9, 2147483647  ;;  %v2887_v9 = vpop.f32.mrb[1].mxu1  ;;  %2865 = vmatprep.mubr.msk.f32.mxu0 %vm680_vm1, %v649_v14  ;;  %v653_v26 = vld [vmem:[%s3296_s30 + $0x40] sm:$0xff] }
 0x167   : > { %vm1507_vm4 = vcmp.lt.s32.totalorder %v1496_v28, %v1506_v42  ;;  %vm1510_vm0 = vcmp.lt.s32.totalorder %v1499_v30, %v1509_v49  ;;  %v1512_v51 = vsel %vm1032_vm6, %v1476_v10, 2147483647  ;;  %v1515_v52 = vsel %vm1032_vm6, %v1477_v11, 2147483647  ;;  %v3681_v13 = vpop.f32.mrb[2].mxu1  ;;  %v654_v27 = vld [vmem:[%s3296_s30 + $0x48] sm:$0xff] }
 0x168   : > { %v1508_v53 = vsel %vm1507_vm4, %v1496_v28, %v1506_v42  ;;  %v1511_v54 = vsel %vm1510_vm0, %v1499_v30, %v1509_v49  ;;  %vm1513_vm8 = vcmp.lt.s32.totalorder %v1502_v31, %v1512_v51  ;;  %vm1516_vm14 = vcmp.lt.s32.totalorder %v1505_v34, %v1515_v52  ;;  %v2892_v17 = vpop.f32.mrb[3].mxu1  ;;  %v1985_v9 = vld [vmem:[%s4250_s8] sm:$0xf] }
 0x169   : > { %v1514_v57 = vsel %vm1513_vm8, %v1502_v31, %v1512_v51  ;;  %v1517_v58 = vsel %vm1516_vm14, %v1505_v34, %v1515_v52  ;;  %vm1518_vm2 = vcmp.lt.s32.totalorder %v1508_v53, %v1511_v54  ;;  %v3177_v8 = vmov 0.0|0.0   ;;  %2866 = vmatmul.mubr.msk.f32.gmra.mrb[4].mxu0 %vm680_vm1, %v650_v15  ;;  %v655_v31 = vld [vmem:[%s3296_s30 + $0x50] sm:$0xff]  ;;  %v656_v34 = vld [vmem:[%s3296_s30 + $0x58] sm:$0xff]  ;;  %v657_v52 = vld [vmem:[%s3296_s30 + $0x60] sm:$0xff] }
 0x16a   : > { %v1519_v59 = vsel %vm1518_vm2, %v1508_v53, %v1511_v54  ;;  %vm1520_vm9 = vcmp.lt.s32.totalorder %v1514_v57, %v1517_v58  ;;  %2979 = vmatprep.subr.bf16.mxu0 %v3177_v8  ;;  %3003 = vmatprep.subr.bf16.mxu1 %v3177_v8  ;;  %v658_v53 = vld [vmem:[%s3296_s30 + $0x68] sm:$0xff]  ;;  %v3179_v2 = vmov 0  }
 0x16b   : > { %v1521_v60 = vsel %vm1520_vm9, %v1514_v57, %v1517_v58  ;;  %2868 = vmatprep.mubr.msk.f32.mxu0 %vm680_vm1, %v651_v19  ;;  %3143 = vset.pattern.permute.xlu0 %v3179_v2 }
 0x16c   : > { %vm1522_vm10 = vcmp.lt.s32.totalorder %v1519_v59, %v1521_v60  ;;  %3144 = vset.pattern.permute.xlu1 %v3179_v2 }
 0x16d   : > { %v1523_v61 = vsel %vm1522_vm10, %v1519_v59, %v1521_v60  ;;  %vm2431_vm10 = vcmask 1041408   ;;  %2869 = vmatmul.mubr.msk.f32.gmra.mrb[6].mxu0 %vm680_vm1, %v652_v20  ;;  %v659_v59 = vld [vmem:[%s3296_s30 + $0x70] sm:$0xff]  ;;  %v660_v60 = vld [vmem:[%s3296_s30 + $0x78] sm:$0xff] }
 0x16e   : > { %v1524_v62 = vrot.slane %v1523_v61, 4  ;;  %2871 = vmatprep.mubr.msk.f32.mxu0 %vm680_vm1, %v653_v26 }
 0x170   : > { %vm1525_vm15 = vcmp.lt.s32.totalorder %v1523_v61, %v1524_v62 }
 0x171   : > { %v1526_v63 = vsel %vm1525_vm15, %v1523_v61, %v1524_v62  ;;  %2872 = vmatmul.mubr.msk.f32.gmra.mrb[8].mxu0 %vm680_vm1, %v654_v27 }
 0x172   : > { %v1527_v0 = vrot.slane %v1526_v63, 2  ;;  %2874 = vmatprep.mubr.msk.f32.mxu0 %vm680_vm1, %v655_v31 }
 0x174   : > { %vm1528_vm12 = vcmp.lt.s32.totalorder %v1526_v63, %v1527_v0 }
 0x175   : > { %v1529_v1 = vsel %vm1528_vm12, %v1526_v63, %v1527_v0  ;;  %2875 = vmatmul.mubr.msk.f32.gmra.mrb[10].mxu0 %vm680_vm1, %v656_v34 }
 0x176   : > { %v1530_v24 = vrot.slane %v1529_v1, 1  ;;  %2877 = vmatprep.mubr.msk.f32.mxu0 %vm680_vm1, %v657_v52 }
 0x178   : > { %vm1531_vm4 = vcmp.lt.s32.totalorder %v1529_v1, %v1530_v24 }
 0x179   : > { %v3659_v5 = vsel %vm1531_vm4, %v1529_v1, %v1530_v24  ;;  %2878 = vmatmul.mubr.msk.f32.gmra.mrb[12].mxu0 %vm680_vm1, %v658_v53  ;;  %v1977_v24 = vld [vmem:[%s4249_s7] sm:$0xf] }
 0x17a   : > { %vm4290_vm0 = vcmp.eq.s32.totalorder %v3337_v29, %v3659_v5  ;;  %vm4289_vm12 = vcmp.eq.s32.totalorder %v3340_v32, %v3659_v5  ;;  %vm4288_vm8 = vcmp.eq.s32.totalorder %v3343_v33, %v3659_v5  ;;  %vm4287_vm14 = vcmp.eq.s32.totalorder %v3346_v35, %v3659_v5  ;;  %2880 = vmatprep.mubr.msk.f32.mxu0 %vm680_vm1, %v659_v59 }
 0x17b   : > { %v2759_v10 = vsel %vm4290_vm0, 1.0, %v3174_v6  ;;  %v2760_v11 = vsel %vm4289_vm12, 1.0, %v3174_v6  ;;  %v2761_v16 = vsel %vm4288_vm8, 1.0, %v3174_v6  ;;  %v2762_v56 = vsel %vm4287_vm14, 1.0, %v3174_v6  ;;  %1980 = vperm.xlu0 %3143, %v1977_v24  }
 0x17c   : > { %v3103_v12 = vpack.i.bf16 %v2760_v11, %v2759_v10  ;;  %vm4276_vm2 = vcmp.eq.s32.totalorder %v3349_v36, %v3659_v5  ;;  %vm4275_vm9 = vcmp.eq.s32.totalorder %v3352_v37, %v3659_v5  ;;  %v3108_v18 = vpack.i.bf16 %v2762_v56, %v2761_v16  ;;  %v2000_v10 = vld [vmem:[#allocation2] sm:$0x1] }
 0x17d   : > { %v2763_v21 = vsel %vm4276_vm2, 1.0, %v3174_v6  ;;  %v2764_v22 = vsel %vm4275_vm9, 1.0, %v3174_v6  ;;  %vm4278_vm15 = vcmp.eq.s32.totalorder %v3355_v38, %v3659_v5  ;;  %vm4277_vm4 = vcmp.eq.s32.totalorder %v3358_v39, %v3659_v5  ;;  %2881 = vmatmul.mubr.msk.f32.gmra.mrb[14].mxu0 %vm680_vm1, %v660_v60 }
 0x17e   : > { %3104 = vrot.lane.b32.xlu1 %v3103_v12, %s3178_s17  ;;  %v2432_v23 = vsel %vm2431_vm10, %v3594_v50, %v3659_v5  ;;  %v3113_v25 = vpack.i.bf16 %v2764_v22, %v2763_v21  ;;  %v2765_v28 = vsel %vm4278_vm15, 1.0, %v3174_v6  ;;  %v2766_v30 = vsel %vm4277_vm4, 1.0, %v3174_v6  ;;  %2925 = vmatprep.mubr.msk.f32.mxu0 %vm3175_vm3, %v3174_v6 }
 0x17f   : > { %2433 = vst.msk [vmem:[%s636_s24] sm:$0x7] %vm730_vm5, %v2432_v23  ;;  %vm4280_vm9 = vcmp.eq.s32.totalorder %v3361_v40, %v3659_v5  ;;  %vm4279_vm2 = vcmp.eq.s32.totalorder %v3364_v41, %v3659_v5  ;;  %v3118_v50 = vpack.i.bf16 %v2766_v30, %v2765_v28  ;;  %vm4282_vm4 = vcmp.eq.s32.totalorder %v3367_v43, %v3659_v5 }
 0x180   : > { %v2767_v42 = vsel %vm4280_vm9, 1.0, %v3174_v6  ;;  %v2768_v49 = vsel %vm4279_vm2, 1.0, %v3174_v6  ;;  %vm4281_vm15 = vcmp.eq.s32.totalorder %v3370_v44, %v3659_v5  ;;  %v2769_v54 = vsel %vm4282_vm4, 1.0, %v3174_v6  ;;  %1988 = vperm.xlu0 %3143, %v1985_v9  }
 0x181   : > { %v3123_v51 = vpack.i.bf16 %v2768_v49, %v2767_v42  ;;  %v2770_v57 = vsel %vm4281_vm15, 1.0, %v3174_v6  ;;  %vm4286_vm2 = vcmp.eq.s32.totalorder %v3373_v45, %v3659_v5  ;;  %vm4285_vm9 = vcmp.eq.s32.totalorder %v3376_v46, %v3659_v5 }
 0x182   : > { %3109 = vrot.lane.b32.xlu1 %v3108_v18, %s3178_s17  ;;  %v3128_v58 = vpack.i.bf16 %v2770_v57, %v2769_v54  ;;  %v2771_v61 = vsel %vm4286_vm2, 1.0, %v3174_v6  ;;  %v2772_v62 = vsel %vm4285_vm9, 1.0, %v3174_v6  ;;  %vm4284_vm15 = vcmp.eq.s32.totalorder %v3379_v47, %v3659_v5 }
 0x183   : > { %vm4283_vm4 = vcmp.eq.s32.totalorder %v3382_v48, %v3659_v5  ;;  %v3133_v63 = vpack.i.bf16 %v2772_v62, %v2771_v61  ;;  %v2773_v0 = vsel %vm4284_vm15, 1.0, %v3174_v6  ;;  %vm1158_vm1 = vcmp.eq.s32.totalorder %v3340_v32, %v3432_v55 }
 0x184   : > { %v2774_v1 = vsel %vm4283_vm4, 1.0, %v3174_v6  ;;  %vm1159_vm3 = vcmp.eq.s32.totalorder %v3343_v33, %v3432_v55  ;;  %vm1160_vm4 = vcmp.eq.s32.totalorder %v3346_v35, %v3432_v55  ;;  %vm1881_vm15 = vcmask 261120  }
 0x185   : > { %v3138_v3 = vpack.i.bf16 %v2774_v1, %v2773_v0  ;;  %v2697_v18 = vsel %vm1157_vm7, 1.0, %v3174_v6  ;;  %v2698_v19 = vsel %vm1158_vm1, 1.0, %v3174_v6  ;;  %v2699_v30 = vsel %vm1159_vm3, 1.0, %v3174_v6 }
 0x186   : > { %3114 = vrot.lane.b32.xlu1 %v3113_v25, %s3178_s17  ;;  %vm1161_vm9 = vcmp.eq.s32.totalorder %v3349_v36, %v3432_v55  ;;  %vm1162_vm2 = vcmp.eq.s32.totalorder %v3352_v37, %v3432_v55  ;;  %vm4292_vm14 = vcmp.eq.s32.totalorder %v3355_v38, %v3432_v55  ;;  %vm4291_vm8 = vcmp.eq.s32.totalorder %v3358_v39, %v3432_v55 }
 0x187   : > { %v2701_v60 = vsel %vm1161_vm9, 1.0, %v3174_v6  ;;  %v2702_v61 = vsel %vm1162_vm2, 1.0, %v3174_v6  ;;  %vm4294_vm12 = vcmp.eq.s32.totalorder %v3361_v40, %v3432_v55  ;;  %vm4293_vm0 = vcmp.eq.s32.totalorder %v3364_v41, %v3432_v55 }
 0x18a   : > { %3119 = vrot.lane.b32.xlu1 %v3118_v50, %s3178_s17  ;;  %v2700_v50 = vsel %vm1160_vm4, 1.0, %v3174_v6 }
 0x18e   : > { %3124 = vrot.lane.b32.xlu1 %v3123_v51, %s3178_s17 }
 0x192   : > { %3129 = vrot.lane.b32.xlu1 %v3128_v58, %s3178_s17 }
 0x196   : > { %3134 = vrot.lane.b32.xlu1 %v3133_v63, %s3178_s17 }
 0x19a   : > { %3139 = vrot.lane.b32.xlu1 %v3138_v3, %s3178_s17 }
 0x19e   : > { %1899 = vrot.lane.b32.xlu1 %v3681_v13, %s3176_s16  ;;  %s3181_s16 = smov 112  }
 0x1a2   : > { %1902 = vrot.lane.b32.xlu1 %v3681_v13, %s3178_s17  ;;  %s643_s17 = scalar_lea.vmem %s4257_s15, %s3286_s23  ;;  %s2658_s23 = sshll.u32 %s4345_s20, 3 }
 0x1a3   : > { %s610_s24 = scalar_lea.vmem %s4244_s2, %s2658_s23 }
 0x1a6   : > { %2003 = vperm.xlu1 %3144, %v2000_v10  }
 0x1c0   : > { %v3070_v11 = vpop.permute.xlu1 %3069  ;;  %v3065_v14 = vpop.permute.xlu0 %3064 }
 0x1c1   : > { %v3067_v16 = vunpack.i.h.bf16 %v3065_v14  ;;  %v3066_v56 = vunpack.i.l.bf16 %v3065_v14  ;;  %v3072_v22 = vunpack.i.h.bf16 %v3070_v11  ;;  %v3071_v23 = vunpack.i.l.bf16 %v3070_v11 }
 0x1c3   : > { %v1866_v25 = vsel %vm1032_vm6, %v2698_v19, %v3067_v16  ;;  %v1865_v26 = vsel %vm1032_vm6, %v2697_v18, %v3066_v56  ;;  %v1868_v52 = vsel %vm1032_vm6, %v2700_v50, %v3072_v22  ;;  %v1867_v53 = vsel %vm1032_vm6, %v2699_v30, %v3071_v23 }
 0x1c4   : > { %v3075_v12 = vpop.permute.xlu1 %3074  ;;  %v3085_v42 = vpop.permute.xlu0 %3084  ;;  %v2704_v56 = vsel %vm4291_vm8, 1.0, %v3174_v6  ;;  %vm4296_vm8 = vcmp.eq.s32.totalorder %v3367_v43, %v3432_v55 }
 0x1c5   : > { %v3077_v54 = vunpack.i.h.bf16 %v3075_v12  ;;  %v3076_v57 = vunpack.i.l.bf16 %v3075_v12  ;;  %v3087_v19 = vunpack.i.h.bf16 %v3085_v42 }
 0x1c7   : > { %v1870_v24 = vsel %vm1032_vm6, %v2702_v61, %v3077_v54  ;;  %v1869_v2 = vsel %vm1032_vm6, %v2701_v60, %v3076_v57 }
 0x1c8   : > { %v3815_v15 = vpop.permute.xlu1 %3079  ;;  %v3090_v10 = vpop.permute.xlu0 %3089 }
 0x1c9   : > { %v3082_v3 = vunpack.i.h.bf16 %v3815_v15  ;;  %v3081_v9 = vunpack.i.l.bf16 %v3815_v15  ;;  %v2703_v15 = vsel %vm4292_vm14, 1.0, %v3174_v6  ;;  %vm4295_vm14 = vcmp.eq.s32.totalorder %v3370_v44, %v3432_v55 }
 0x1ca   : > { %v2708_v60 = vsel %vm4295_vm14, 1.0, %v3174_v6  ;;  %vm1171_vm14 = vcmp.eq.s32.totalorder %v3379_v47, %v3432_v55 }
 0x1cb   : > { %v1871_v22 = vsel %vm1032_vm6, %v2703_v15, %v3081_v9 }
 0x1cc   : > { %v3095_v50 = vpop.permute.xlu0 %3094 }
 0x1f0   : > { %v3105_v17 = vpop.permute.xlu1 %3104 }
 0x1f1   : > { %v3107_v20 = vunpack.i.h.bf16 %v3105_v17  ;;  %v3106_v21 = vunpack.i.l.bf16 %v3105_v17 }
 0x1f3   : > { %v1883_v27 = vsel %vm1881_vm15, %v1866_v25, %v3107_v20  ;;  %v1882_v28 = vsel %vm1881_vm15, %v1865_v26, %v3106_v21  ;;  %v3086_v20 = vunpack.i.l.bf16 %v3085_v42  ;;  %v1872_v21 = vsel %vm1032_vm6, %v2704_v56, %v3082_v3 }
 0x1f4   : > { %v2980_v31 = vpack.c.bf16 %v1883_v27, %v1882_v28  ;;  %v3110_v34 = vpop.permute.xlu1 %3109  ;;  %v2705_v26 = vsel %vm4294_vm12, 1.0, %v3174_v6  ;;  %v2706_v27 = vsel %vm4293_vm0, 1.0, %v3174_v6  ;;  %vm1169_vm0 = vcmp.eq.s32.totalorder %v3373_v45, %v3432_v55 }
 0x1f5   : > { %v3112_v49 = vunpack.i.h.bf16 %v3110_v34  ;;  %v3111_v51 = vunpack.i.l.bf16 %v3110_v34  ;;  %v1874_v42 = vsel %vm1032_vm6, %v2706_v27, %v3087_v19  ;;  %vm1170_vm12 = vcmp.eq.s32.totalorder %v3376_v46, %v3432_v55 }
 0x1f6   : > { %2981 = vmatpush3.bf16.msra.mxu0 %v2980_v31 }
 0x1f7   : > { %v1885_v58 = vsel %vm1881_vm15, %v1868_v52, %v3112_v49  ;;  %v1884_v59 = vsel %vm1881_vm15, %v1867_v53, %v3111_v51  ;;  %2982 = vmatprep.subr.bf16.mxu0 %v3177_v8  ;;  %v1873_v49 = vsel %vm1032_vm6, %v2705_v26, %v3086_v20  ;;  %v3092_v51 = vunpack.i.h.bf16 %v3090_v10 }
 0x1f8   : > { %v2983_v62 = vpack.c.bf16 %v1885_v58, %v1884_v59  ;;  %v3115_v63 = vpop.permute.xlu1 %3114  ;;  %v3091_v52 = vunpack.i.l.bf16 %v3090_v10  ;;  %v2707_v59 = vsel %vm4296_vm8, 1.0, %v3174_v6  ;;  %v2709_v10 = vsel %vm1169_vm0, 1.0, %v3174_v6 }
 0x1f9   : > { %v3117_v0 = vunpack.i.h.bf16 %v3115_v63  ;;  %v3116_v1 = vunpack.i.l.bf16 %v3115_v63  ;;  %v1876_v63 = vsel %vm1032_vm6, %v2708_v60, %v3092_v51  ;;  %vm1172_vm8 = vcmp.eq.s32.totalorder %v3382_v48, %v3432_v55 }
 0x1fa   : > { %2984 = vmatpush3.bf16.msra.mxu0 %v2983_v62  ;;  %v2712_v26 = vsel %vm1172_vm8, 1.0, %v3174_v6 }
 0x1fb   : > { %v1887_v11 = vsel %vm1881_vm15, %v1870_v24, %v3117_v0  ;;  %v1886_v12 = vsel %vm1881_vm15, %v1869_v2, %v3116_v1  ;;  %2985 = vmatprep.subr.bf16.mxu0 %v3177_v8  ;;  %v1875_v0 = vsel %vm1032_vm6, %v2707_v59, %v3091_v52  ;;  %v3097_v1 = vunpack.i.h.bf16 %v3095_v50  ;;  %v3100_v2 = vpop.permute.xlu0 %3099 }
 0x1fc   : > { %v2986_v14 = vpack.c.bf16 %v1887_v11, %v1886_v12  ;;  %v3120_v16 = vpop.permute.xlu1 %3119  ;;  %v3096_v24 = vunpack.i.l.bf16 %v3095_v50  ;;  %v2710_v11 = vsel %vm1170_vm12, 1.0, %v3174_v6  ;;  %v3101_v19 = vunpack.i.l.bf16 %v3100_v2 }
 0x1fd   : > { %v3122_v17 = vunpack.i.h.bf16 %v3120_v16  ;;  %v3121_v18 = vunpack.i.l.bf16 %v3120_v16  ;;  %v1878_v56 = vsel %vm1032_vm6, %v2710_v11, %v3097_v1 }
 0x1fe   : > { %2987 = vmatpush3.bf16.msra.mxu0 %v2986_v14 }
 0x1ff   : > { %v1889_v23 = vsel %vm1881_vm15, %v1872_v21, %v3122_v17  ;;  %v1888_v25 = vsel %vm1881_vm15, %v1871_v22, %v3121_v18  ;;  %2988 = vmatprep.subr.bf16.mxu0 %v3177_v8  ;;  %v1877_v17 = vsel %vm1032_vm6, %v2709_v10, %v3096_v24  ;;  %v3102_v18 = vunpack.i.h.bf16 %v3100_v2 }
 0x200   : > { %v2989_v28 = vpack.c.bf16 %v1889_v23, %v1888_v25  ;;  %v3125_v30 = vpop.permute.xlu1 %3124  ;;  %v2711_v25 = vsel %vm1171_vm14, 1.0, %v3174_v6 }
 0x201   : > { %v3127_v31 = vunpack.i.h.bf16 %v3125_v30  ;;  %v3126_v34 = vunpack.i.l.bf16 %v3125_v30  ;;  %v1880_v30 = vsel %vm1032_vm6, %v2712_v26, %v3102_v18  ;;  %v1879_v50 = vsel %vm1032_vm6, %v2711_v25, %v3101_v19 }
 0x202   : > { %2990 = vmatpush3.bf16.msra.mxu0 %v2989_v28  ;;  %v2008_v19 = vsub.s32 0, %v3337_v29 }
 0x203   : > { %v1891_v53 = vsel %vm1881_vm15, %v1874_v42, %v3127_v31  ;;  %v1890_v54 = vsel %vm1881_vm15, %v1873_v49, %v3126_v34  ;;  %2991 = vmatprep.subr.bf16.mxu0 %v3177_v8 }
 0x204   : > { %v2992_v57 = vpack.c.bf16 %v1891_v53, %v1890_v54  ;;  %v3130_v58 = vpop.permute.xlu1 %3129 }
 0x205   : > { %v3132_v61 = vunpack.i.h.bf16 %v3130_v58  ;;  %v3131_v62 = vunpack.i.l.bf16 %v3130_v58 }
 0x206   : > { %2993 = vmatpush3.bf16.msra.mxu0 %v2992_v57 }
 0x207   : > { %v1893_v3 = vsel %vm1881_vm15, %v1876_v63, %v3132_v61  ;;  %v1892_v9 = vsel %vm1881_vm15, %v1875_v0, %v3131_v62  ;;  %2994 = vmatprep.subr.bf16.mxu0 %v3177_v8 }
 0x208   : > { %v2995_v12 = vpack.c.bf16 %v1893_v3, %v1892_v9  ;;  %v3135_v14 = vpop.permute.xlu1 %3134 }
 0x209   : > { %v3137_v16 = vunpack.i.h.bf16 %v3135_v14  ;;  %v3136_v15 = vunpack.i.l.bf16 %v3135_v14 }
 0x20a   : > { %2996 = vmatpush3.bf16.msra.mxu0 %v2995_v12 }
 0x20b   : > { %v1895_v20 = vsel %vm1881_vm15, %v1878_v56, %v3137_v16  ;;  %v1894_v21 = vsel %vm1881_vm15, %v1877_v17, %v3136_v15  ;;  %2997 = vmatprep.subr.bf16.mxu0 %v3177_v8 }
 0x20c   : > { %v2998_v22 = vpack.c.bf16 %v1895_v20, %v1894_v21  ;;  %v3140_v23 = vpop.permute.xlu1 %3139 }
 0x20d   : > { %v3142_v27 = vunpack.i.h.bf16 %v3140_v23  ;;  %v3141_v28 = vunpack.i.l.bf16 %v3140_v23 }
 0x20e   : > { %2999 = vmatpush3.bf16.msra.mxu0 %v2998_v22 }
 0x20f   : > { %v1897_v31 = vsel %vm1881_vm15, %v1880_v30, %v3142_v27  ;;  %v1896_v34 = vsel %vm1881_vm15, %v1879_v50, %v3141_v28  ;;  %3000 = vmatprep.subr.bf16.mxu0 %v3177_v8 }
 0x210   : > { %v3001_v42 = vpack.c.bf16 %v1897_v31, %v1896_v34  ;;  %v1900_v49 = vpop.permute.xlu1 %1899  ;;  %v2394_v34 = vld [vmem:[%s4254_s12 + $0x8] sm:$0xff] }
 0x211   : > { %v1905_v51 = vsel %vm1032_vm6, %v3681_v13, %v1900_v49  ;;  %v1981_v13 = vpop.permute.xlu0 %1980  ;;  %v2396_v49 = vld [vmem:[%s4254_s12 + $0x18] sm:$0xff] }
 0x212   : > { %3002 = vmatpush3.bf16.msra.mxu0 %v3001_v42  ;;  %v2393_v42 = vld [vmem:[%s4254_s12] sm:$0xff] }
 0x214   : > { %v1903_v6 = vpop.permute.xlu1 %1902 }
 0x215   : > { %2926 = vmatmul.mubr.f32.vlgmr.msra.gmra.mrb[16].mxu0 %v3657_v4  ;;  %v1906_v52 = vsel %vm1881_vm15, %v1905_v51, %v1903_v6  ;;  %vm1992_vm15 = vcmask 388096   ;;  %v1989_v14 = vpop.permute.xlu0 %1988  ;;  %v2395_v51 = vld [vmem:[%s4254_s12 + $0x10] sm:$0xff] }
 0x225   : > { %v2004_v20 = vpop.permute.xlu1 %2003 }
 0x226   : > { %v2009_v23 = vrot.slane %v2004_v20, %v2008_v19 }
 0x238   : > { %v2864_v53 = vpop.f32.mrb[2].mxu0 }
 0x239   : > { %v866_v54 = vpop.f32.mrb[3].mxu0 }
 0x23c   : > { %v2867_v57 = vpop.f32.mrb[4].mxu0 }
 0x23d   : > { %v876_v58 = vpop.f32.mrb[5].mxu0 }
 0x240   : > { %v2870_v59 = vpop.f32.mrb[6].mxu0 }
 0x241   : > { %v886_v60 = vpop.f32.mrb[7].mxu0 }
 0x244   : > { %v2873_v61 = vpop.f32.mrb[8].mxu0 }
 0x245   : > { %v896_v62 = vpop.f32.mrb[9].mxu0 }
 0x248   : > { %v2876_v63 = vpop.f32.mrb[10].mxu0 }
 0x249   : > { %v906_v0 = vpop.f32.mrb[11].mxu0 }
 0x24c   : > { %v2879_v1 = vpop.f32.mrb[12].mxu0 }
 0x24d   : > { %v916_v24 = vpop.f32.mrb[13].mxu0 }
 0x250   : > { %v2882_v2 = vpop.f32.mrb[14].mxu0 }
 0x251   : > { %v926_v3 = vpop.f32.mrb[15].mxu0 }
 0x2e8   : > { %v1973_v9 = vpop.f32.mrb[16].mxu0 }
 0x2e9   : > { %v1974_v10 = vadd.f32 %v1973_v9, %v1906_v52  ;;  %v2927_v4 = vpop.f32.mrb[17].mxu0 }
 0x2eb   : > { %v1983_v11 = vadd.f32 %v1981_v13, %v1974_v10 }
 0x2ed   : > { %v1984_v12 = vmax.f32 %v1983_v11, 0.0 }
 0x2ef   : > { %v1991_v16 = vmul.f32 %v1989_v14, %v1984_v12 }
 0x2f1   : > { %v1993_v15 = vsel %vm1992_vm15, %v1991_v16, 0.0  ;;  %vm4307_vm15 = vcmp.eq.s32.totalorder %v3358_v39, %v3492_v7 }
 0x2f2   : > { %v1994_v56 = vrot.slane %v1993_v15, 4 }
 0x2f4   : > { %v1995_v17 = vadd.f32 %v1994_v56, %v1993_v15 }
 0x2f6   : > { %v1996_v18 = vrot.slane %v1995_v17, 2 }
 0x2f8   : > { %v1997_v21 = vadd.f32 %v1996_v18, %v1995_v17 }
 0x2fa   : > { %v1998_v22 = vrot.slane %v1997_v21, 1 }
 0x2fc   : > { %v1999_v25 = vadd.f32 %v1998_v22, %v1997_v21 }
 0x2fe   : > { %v2010_v26 = vadd.f32 %v2009_v23, %v1999_v25 }
 0x300   : > { %v2011_v27 = vsub.f32 0.0, %v2010_v26 }
 0x302   : > { %v2012_v28 = vmul.f32 1.442695, %v2011_v27 }
 0x304   : > { %3145 = vpow2.f32 %v2012_v28 }
 0x30e   : > { %v3146_v30 = vpop.eup %3145 }
 0x30f   : > { %v2014_v50 = vadd.f32 1.0, %v3146_v30 }
 0x311   : > { %3147 = vrcp.f32 %v2014_v50 }
 0x31b   : > { %v3957_v31 = vpop.eup %3147 }
 0x31c   : > { %2085 = vrot.lane.b32.xlu1 %v3957_v31, %s3180_s29  ;;  %2050 = vrot.lane.b32.xlu0 %v3957_v31, %s3181_s16  ;;  %v2017_v53 = vsel %vm1157_vm7, %v3957_v31, 0.0  ;;  %v2018_v54 = vsel %vm1158_vm1, %v3957_v31, 0.0  ;;  %v2019_v57 = vsel %vm1159_vm3, %v3957_v31, 0.0  ;;  %v2020_v58 = vsel %vm1160_vm4, %v3957_v31, 0.0  ;;  %s2791_s29 = sshll.u32 %s4345_s20, 5 }
 0x31d   : > { %vm4297_vm7 = vcmp.eq.s32.totalorder %v3340_v32, %v3492_v7  ;;  %v2021_v62 = vsel %vm1161_vm9, %v3957_v31, 0.0  ;;  %v2022_v24 = vsel %vm1162_vm2, %v3957_v31, 0.0  ;;  %vm4300_vm9 = vcmp.eq.s32.totalorder %v3343_v33, %v3492_v7 }
 0x31e   : > { %vm4301_vm2 = vcmp.eq.s32.totalorder %v3346_v35, %v3492_v7  ;;  %vm4304_vm4 = vcmp.eq.s32.totalorder %v3349_v36, %v3492_v7  ;;  %vm4305_vm1 = vcmp.eq.s32.totalorder %v3352_v37, %v3492_v7  ;;  %vm4306_vm3 = vcmp.eq.s32.totalorder %v3355_v38, %v3492_v7 }
 0x320   : > { %2404 = vperm.xlu1 %3144, %v2394_v34   ;;  %2399 = vperm.xlu0 %3143, %v2393_v42  }
 0x324   : > { %2414 = vperm.xlu1 %3144, %v2396_v49   ;;  %2409 = vperm.xlu0 %3143, %v2395_v51  }
 0x38e   : > { %v3977_v6 = vpop.permute.xlu1 %2085  ;;  %v3979_v52 = vpop.permute.xlu0 %2050 }
 0x38f   : > { %v2434_v59 = vsel %vm2429_vm13, %v3957_v31, %v3979_v52  ;;  %v2053_v60 = vsel %vm1345_vm11, %v3979_v52, 0.0  ;;  %v2054_v61 = vsel %vm4297_vm7, %v3979_v52, 0.0  ;;  %vm4298_vm11 = vcmp.eq.s32.totalorder %v3337_v29, %v3659_v5 }
 0x390   : > { %v2435_v63 = vsel %vm2431_vm10, %v2434_v59, %v3977_v6  ;;  %v2069_v0 = vadd.f32 %v2053_v60, %v2017_v53  ;;  %v2070_v1 = vadd.f32 %v2054_v61, %v2018_v54  ;;  %v2088_v2 = vsel %vm4298_vm11, %v3977_v6, 0.0 }
 0x391   : > { %2436 = vst.msk [vmem:[%s643_s17] sm:$0x7] %vm730_vm5, %v2435_v63  ;;  %vm4299_vm13 = vcmp.eq.s32.totalorder %v3340_v32, %v3659_v5  ;;  %v2055_v13 = vsel %vm4300_vm9, %v3979_v52, 0.0  ;;  %v2056_v9 = vsel %vm4301_vm2, %v3979_v52, 0.0  ;;  %vm4302_vm5 = vcmp.eq.s32.totalorder %v3343_v33, %v3659_v5  ;;  %s629_s17 = scalar_lea.vmem %s4255_s13, %s2791_s29 }
 0x392   : > { %v2089_v3 = vsel %vm4299_vm13, %v3977_v6, 0.0  ;;  %v2104_v10 = vadd.f32 %v2088_v2, %v2069_v0  ;;  %v2071_v11 = vadd.f32 %v2055_v13, %v2019_v57  ;;  %v2072_v29 = vadd.f32 %v2056_v9, %v2020_v58 }
 0x393   : > { %v2105_v4 = vadd.f32 %v2089_v3, %v2070_v1  ;;  %v2090_v32 = vsel %vm4302_vm5, %v3977_v6, 0.0  ;;  %vm4303_vm10 = vcmp.eq.s32.totalorder %v3346_v35, %v3659_v5  ;;  %v2057_v14 = vsel %vm4304_vm4, %v3979_v52, 0.0 }
 0x394   : > { %v2091_v12 = vsel %vm4303_vm10, %v3977_v6, 0.0  ;;  %v2058_v16 = vsel %vm4305_vm1, %v3979_v52, 0.0  ;;  %v2106_v56 = vadd.f32 %v2090_v32, %v2071_v11  ;;  %v2073_v33 = vadd.f32 %v2057_v14, %v2021_v62 }
 0x395   : > { %v3004_v15 = vpack.c.bf16 %v2105_v4, %v2104_v10  ;;  %v2107_v17 = vadd.f32 %v2091_v12, %v2072_v29  ;;  %v2074_v18 = vadd.f32 %v2058_v16, %v2022_v24  ;;  %v2059_v35 = vsel %vm4306_vm3, %v3979_v52, 0.0 }
 0x396   : > { %v2060_v19 = vsel %vm4307_vm15, %v3979_v52, 0.0  ;;  %vm4308_vm7 = vcmp.eq.s32.totalorder %v3355_v38, %v3432_v55  ;;  %vm4309_vm11 = vcmp.eq.s32.totalorder %v3358_v39, %v3432_v55  ;;  %vm4310_vm13 = vcmp.eq.s32.totalorder %v3349_v36, %v3659_v5 }
 0x397   : > { %3005 = vmatpush3.bf16.msra.mxu1 %v3004_v15  ;;  %v2023_v20 = vsel %vm4308_vm7, %v3957_v31, 0.0  ;;  %v2024_v21 = vsel %vm4309_vm11, %v3957_v31, 0.0  ;;  %v2092_v22 = vsel %vm4310_vm13, %v3977_v6, 0.0  ;;  %vm4311_vm9 = vcmp.eq.s32.totalorder %v3352_v37, %v3659_v5 }
 0x398   : > { %3006 = vmatprep.subr.bf16.mxu1 %v3177_v8  ;;  %v2093_v23 = vsel %vm4311_vm9, %v3977_v6, 0.0  ;;  %v2075_v25 = vadd.f32 %v2059_v35, %v2023_v20  ;;  %v2076_v26 = vadd.f32 %v2060_v19, %v2024_v21  ;;  %v3007_v27 = vpack.c.bf16 %v2107_v17, %v2106_v56  ;;  %v3149_v20 = vld [vmem:[%s3320_s27] sm:$0xf]  ;;  %v2197_v21 = vld [vmem:[%s4253_s11 + $0x18] sm:$0xff] }
 0x399   : > { %v2108_v28 = vadd.f32 %v2092_v22, %v2073_v33  ;;  %v2109_v30 = vadd.f32 %v2093_v23, %v2074_v18  ;;  %vm4312_vm2 = vcmp.eq.s32.totalorder %v3361_v40, %v3492_v7  ;;  %vm4313_vm5 = vcmp.eq.s32.totalorder %v3364_v41, %v3492_v7  ;;  %v2191_v23 = vld [vmem:[%s4252_s10 + $0x8] sm:$0xff] }
 0x39a   : > { %v2061_v50 = vsel %vm4312_vm2, %v3979_v52, 0.0  ;;  %v2062_v36 = vsel %vm4313_vm5, %v3979_v52, 0.0  ;;  %vm4314_vm10 = vcmp.eq.s32.totalorder %v3355_v38, %v3659_v5  ;;  %vm4315_vm4 = vcmp.eq.s32.totalorder %v3358_v39, %v3659_v5 }
 0x39b   : > { %3008 = vmatpush3.bf16.msra.mxu1 %v3007_v27  ;;  %v2094_v37 = vsel %vm4314_vm10, %v3977_v6, 0.0  ;;  %v2095_v34 = vsel %vm4315_vm4, %v3977_v6, 0.0  ;;  %vm4316_vm1 = vcmp.eq.s32.totalorder %v3361_v40, %v3432_v55  ;;  %vm4317_vm3 = vcmp.eq.s32.totalorder %v3364_v41, %v3432_v55  ;;  %v2193_v27 = vld [vmem:[%s4252_s10 + $0x18] sm:$0xff] }
 0x39c   : > { %v2025_v42 = vsel %vm4316_vm1, %v3957_v31, 0.0  ;;  %3009 = vmatprep.subr.bf16.mxu1 %v3177_v8  ;;  %v2110_v49 = vadd.f32 %v2094_v37, %v2075_v25  ;;  %v2111_v51 = vadd.f32 %v2095_v34, %v2076_v26  ;;  %v2026_v38 = vsel %vm4317_vm3, %v3957_v31, 0.0  ;;  %v2192_v26 = vld [vmem:[%s4252_s10 + $0x10] sm:$0xff] }
 0x39d   : > { %v2077_v53 = vadd.f32 %v2061_v50, %v2025_v42  ;;  %v3010_v54 = vpack.c.bf16 %v2109_v30, %v2108_v28  ;;  %v2078_v57 = vadd.f32 %v2062_v36, %v2026_v38  ;;  %vm4318_vm15 = vcmp.eq.s32.totalorder %v3367_v43, %v3492_v7 }
 0x39e   : > { %v2063_v39 = vsel %vm4318_vm15, %v3979_v52, 0.0  ;;  %vm4319_vm7 = vcmp.eq.s32.totalorder %v3370_v44, %v3492_v7  ;;  %vm4320_vm11 = vcmp.eq.s32.totalorder %v3367_v43, %v3432_v55  ;;  %vm4321_vm13 = vcmp.eq.s32.totalorder %v3370_v44, %v3432_v55 }
 0x39f   : > { %v2064_v58 = vsel %vm4319_vm7, %v3979_v52, 0.0  ;;  %3011 = vmatpush3.bf16.msra.mxu1 %v3010_v54  ;;  %v2027_v59 = vsel %vm4320_vm11, %v3957_v31, 0.0  ;;  %v2028_v60 = vsel %vm4321_vm13, %v3957_v31, 0.0  ;;  %vm4322_vm9 = vcmp.eq.s32.totalorder %v3361_v40, %v3659_v5  ;;  %v2405_v37 = vpop.permute.xlu1 %2404  ;;  %v2400_v42 = vpop.permute.xlu0 %2399 }
 0x3a0   : > { %3012 = vmatprep.subr.bf16.mxu1 %v3177_v8  ;;  %v2096_v61 = vsel %vm4322_vm9, %v3977_v6, 0.0  ;;  %vm4323_vm2 = vcmp.eq.s32.totalorder %v3364_v41, %v3659_v5  ;;  %v2079_v63 = vadd.f32 %v2063_v39, %v2027_v59  ;;  %v2080_v0 = vadd.f32 %v2064_v58, %v2028_v60 }
 0x3a1   : > { %v2097_v62 = vsel %vm4323_vm2, %v3977_v6, 0.0  ;;  %v3013_v1 = vpack.c.bf16 %v2111_v51, %v2110_v49  ;;  %v2112_v24 = vadd.f32 %v2096_v61, %v2077_v53  ;;  %vm4324_vm5 = vcmp.eq.s32.totalorder %v3373_v45, %v3492_v7 }
 0x3a2   : > { %v2113_v2 = vadd.f32 %v2097_v62, %v2078_v57  ;;  %v2065_v3 = vsel %vm4324_vm5, %v3979_v52, 0.0  ;;  %vm4325_vm10 = vcmp.eq.s32.totalorder %v3376_v46, %v3492_v7  ;;  %vm4326_vm4 = vcmp.eq.s32.totalorder %v3367_v43, %v3659_v5 }
 0x3a3   : > { %v2066_v40 = vsel %vm4325_vm10, %v3979_v52, 0.0  ;;  %3014 = vmatpush3.bf16.msra.mxu1 %v3013_v1  ;;  %v2098_v41 = vsel %vm4326_vm4, %v3977_v6, 0.0  ;;  %vm4327_vm1 = vcmp.eq.s32.totalorder %v3370_v44, %v3659_v5  ;;  %v2029_v4 = vsel %vm1169_vm0, %v3957_v31, 0.0  ;;  %v2415_v60 = vpop.permute.xlu1 %2414 }
 0x3a4   : > { %v2099_v13 = vsel %vm4327_vm1, %v3977_v6, 0.0  ;;  %3015 = vmatprep.subr.bf16.mxu1 %v3177_v8  ;;  %v2114_v9 = vadd.f32 %v2098_v41, %v2079_v63  ;;  %v2030_v43 = vsel %vm1170_vm12, %v3957_v31, 0.0  ;;  %v3016_v11 = vpack.c.bf16 %v2113_v2, %v2112_v24  ;;  %v2410_v63 = vpop.permute.xlu0 %2409 }
 0x3a5   : > { %v2115_v10 = vadd.f32 %v2099_v13, %v2080_v0  ;;  %v2081_v29 = vadd.f32 %v2065_v3, %v2029_v4  ;;  %v2082_v32 = vadd.f32 %v2066_v40, %v2030_v43  ;;  %vm4328_vm3 = vcmp.eq.s32.totalorder %v3379_v47, %v3492_v7 }
 0x3a6   : > { %v2067_v44 = vsel %vm4328_vm3, %v3979_v52, 0.0  ;;  %vm4329_vm15 = vcmp.eq.s32.totalorder %v3382_v48, %v3492_v7  ;;  %v2031_v14 = vsel %vm1171_vm14, %v3957_v31, 0.0  ;;  %vm4330_vm0 = vcmp.eq.s32.totalorder %v3373_v45, %v3659_v5 }
 0x3a7   : > { %v2068_v12 = vsel %vm4329_vm15, %v3979_v52, 0.0  ;;  %3017 = vmatpush3.bf16.msra.mxu1 %v3016_v11  ;;  %v3019_v16 = vpack.c.bf16 %v2115_v10, %v2114_v9  ;;  %v2100_v15 = vsel %vm4330_vm0, %v3977_v6, 0.0  ;;  %vm4331_vm12 = vcmp.eq.s32.totalorder %v3376_v46, %v3659_v5 }
 0x3a8   : > { %3018 = vmatprep.subr.bf16.mxu1 %v3177_v8  ;;  %v2101_v7 = vsel %vm4331_vm12, %v3977_v6, 0.0  ;;  %v2032_v52 = vsel %vm1172_vm8, %v3957_v31, 0.0  ;;  %v2116_v56 = vadd.f32 %v2100_v15, %v2081_v29  ;;  %v2083_v33 = vadd.f32 %v2067_v44, %v2031_v14 }
 0x3a9   : > { %v2117_v17 = vadd.f32 %v2101_v7, %v2082_v32  ;;  %v2084_v18 = vadd.f32 %v2068_v12, %v2032_v52  ;;  %vm4332_vm14 = vcmp.eq.s32.totalorder %v3379_v47, %v3659_v5  ;;  %vm4333_vm7 = vcmp.eq.s32.totalorder %v3382_v48, %v3659_v5  ;;  %v661_v47 = vld [vmem:[%s610_s24] sm:$0xff] }
 0x3aa   : > { %v2102_v45 = vsel %vm4332_vm14, %v3977_v6, 0.0  ;;  %v2103_v46 = vsel %vm4333_vm7, %v3977_v6, 0.0  ;;  %vm4334_vm8 = vcmask 1043456   ;;  %v2194_v48 = vld [vmem:[%s4253_s11] sm:$0xff]  ;;  %vm4336_vm13 = vcmask 31744   ;;  %v2196_v6 = vld [vmem:[%s4253_s11 + $0x10] sm:$0xff] }
 0x3ab   : > { %3020 = vmatpush3.bf16.msra.mxu1 %v3019_v16  ;;  %v3022_v55 = vpack.c.bf16 %v2117_v17, %v2116_v56  ;;  %v2118_v31 = vadd.f32 %v2102_v45, %v2083_v33  ;;  %v2119_v35 = vadd.f32 %v2103_v46, %v2084_v18  ;;  %vm4335_vm11 = vmmov %vm4334_vm8  ;;  %v2190_v5 = vld [vmem:[%s4252_s10] sm:$0xff]  ;;  %vm2295_vm9 = vcmask 64512  }
 0x3ac   : > { %3021 = vmatprep.subr.bf16.mxu1 %v3177_v8  ;;  %2973 = vmatprep.mubr.msk.f32.mxu0 %vm2295_vm9, %v2190_v5  ;;  %vm4337_vm2 = vmmov %vm4336_vm13 }
 0x3ad   : > { %v3025_v19 = vpack.c.bf16 %v2119_v35, %v2118_v31  ;;  %vm4338_vm5 = vmmov %vm4337_vm2 }
 0x3ae   : > { %vm4339_vm10 = vmmov %vm4337_vm2 }
 0x3af   : > { %3023 = vmatpush3.bf16.msra.mxu1 %v3022_v55 }
 0x3b0   : > { %3024 = vmatprep.subr.bf16.mxu1 %v3177_v8  ;;  %v2195_v8 = vld [vmem:[%s4253_s11 + $0x8] sm:$0xff] }
 0x3b3   : > { %3026 = vmatpush3.bf16.msra.mxu1 %v3025_v19 }
 0x3b4   : > { %2963 = vmatprep.subr.msk.mxu1 %vm4334_vm8, %v3149_v20 }
 0x3b6   : > { %2961 = vmatmul.mubr.f32.vlgmr.msra.gmra.mrb[4].mxu1 %v661_v47 }
 0x3b7   : > { %2964 = vmatpush3.msk.msra.mxu1 %vm4335_vm11, %v3149_v20  ;;  %2965 = vmatprep.mubr.msk.f32.mxu1 %vm4336_vm13, %v2194_v48 }
 0x3ba   : > { %2966 = vmatmul.mubr.msk.f32.vlgmr.msra.gmra.mrb[6].mxu1 %vm4337_vm2, %v2195_v8 }
 0x3bb   : > { %2968 = vmatprep.mubr.msk.f32.mxu1 %vm4338_vm5, %v2196_v6 }
 0x3be   : > { %2969 = vmatmul.mubr.msk.f32.gmra.mrb[8].mxu1 %vm4339_vm10, %v2197_v21 }
 0x489   : > { %v2186_v22 = vpop.f32.mrb[4].mxu1 }
 0x48a   : > { %v2962_v25 = vpop.f32.mrb[5].mxu1  ;;  %2971 = vmatprep.subr.mxu0 %v2186_v22 }
 0x48b   : > { %2972 = vmatpush3.msra.mxu0 %v2186_v22 }
 0x48c   : > { %2974 = vmatmul.mubr.msk.f32.vlgmr.msra.gmra.mrb[18].mxu0 %vm2295_vm9, %v2191_v23 }
 0x48d   : > { %2976 = vmatprep.mubr.msk.f32.mxu0 %vm2295_vm9, %v2192_v26  ;;  %v2967_v28 = vpop.f32.mrb[6].mxu1 }
 0x48e   : > { %v2276_v30 = vpop.f32.mrb[7].mxu1 }
 0x490   : > { %2977 = vmatmul.mubr.msk.f32.gmra.mrb[20].mxu0 %vm2295_vm9, %v2193_v27 }
 0x491   : > { %v2970_v50 = vpop.f32.mrb[8].mxu1 }
 0x492   : > { %v2286_v36 = vpop.f32.mrb[9].mxu1 }
 0x55f   : > { %v2975_v34 = vpop.f32.mrb[18].mxu0 }
 0x560   : > { %v2380_v49 = vadd.f32 %v2975_v34, %v2967_v28  ;;  %v2374_v51 = vpop.f32.mrb[19].mxu0 }
 0x561   : > { %v2375_v38 = vadd.f32 %v2374_v51, %v2276_v30 }
 0x562   : > { %v2418_v53 = vadd.f32 %v2405_v37, %v2380_v49 }
 0x563   : > { %v2417_v54 = vadd.f32 %v2400_v42, %v2375_v38  ;;  %v2978_v57 = vpop.f32.mrb[20].mxu0 }
 0x564   : > { %v2422_v39 = vmax.f32 %v2418_v53, 0.0  ;;  %v2390_v58 = vadd.f32 %v2978_v57, %v2970_v50  ;;  %v2384_v59 = vpop.f32.mrb[21].mxu0 }
 0x565   : > { %v2421_v61 = vmax.f32 %v2417_v54, 0.0  ;;  %v2385_v62 = vadd.f32 %v2384_v59, %v2286_v36 }
 0x566   : > { %2426 = vst.msk [vmem:[%s629_s17 + $0x8] sm:$0xff] %vm1032_vm6, %v2422_v39  ;;  %v2420_v0 = vadd.f32 %v2415_v60, %v2390_v58 }
 0x567   : > { %2425 = vst.msk [vmem:[%s629_s17] sm:$0xff] %vm1032_vm6, %v2421_v61  ;;  %v2419_v1 = vadd.f32 %v2410_v63, %v2385_v62 }
 0x568   : > { %v2424_v24 = vmax.f32 %v2420_v0, 0.0 }
 0x569   : > { %v2423_v2 = vmax.f32 %v2419_v1, 0.0 }
 0x56a   : > { %2428 = vst.msk [vmem:[%s629_s17 + $0x18] sm:$0xff] %vm1032_vm6, %v2424_v24 }
 0x56b   : > { %2427 = vst.msk [vmem:[%s629_s17 + $0x10] sm:$0xff] %vm1032_vm6, %v2423_v2 }
 0x56c PF: > { %s28_s22 = sadd.s32 1, %s3172_s22   ;;  %s4340_s20 = smov %s3168_s21 }
 0x56d   : > { %p25_p5 = scmp.ge.s32.totalorder %s28_s22, 4   ;;  %s4341_s21 = smov %s4343_s9 }
 0x56f   :  { %27 = sbr.rel (!%p25_p5) target bundleno = 3 (0x3), region = 138 }

</bundles_post_ra>
